<compile_context>
chip_gen: v7x
topology: tpu7x:2x2x1
jax: 0.10.0
libtpu: 0.0.40
codegen_flags: <defaults>
</compile_context>

<pallas_src>
import functools

import jax
import jax.numpy as jnp
from jax.experimental import pallas as pl
from jax.experimental.pallas import tpu as pltpu

# Architecture dims (from the PyTorch module)
ENC_DIMS = [28 * 28, 128, 64, 12, 3]   # Linear(784,128) Tanh ... Linear(12,3)
DEC_DIMS = [3, 12, 64, 128, 28 * 28]   # Linear(3,12) Tanh ... Linear(128,784) Sigmoid
LATENT = ENC_DIMS[-1]                  # 3
LATENT_PAD = 128                       # lane-dense latent slab width


def _round_up(a, b):
    return ((a + b - 1) // b) * b


def autoencoder_kernel(x_ref,
                       # encoder params
                       ew1, eb1, ew2, eb2, ew3, eb3, ew4, eb4,
                       # decoder params (dw1 has its input dim padded to LATENT_PAD)
                       dw1, db1, dw2, db2, dw3, db3, dw4, db4,
                       # outputs
                       enc_ref, dec_ref):
    def dense(h, w_ref, b_ref):
        # Cast activations to the weight dtype (bf16 for the two big layers) so
        # the MXU runs in native bf16 mode; accumulate in f32, add f32 bias.
        return jnp.dot(h.astype(w_ref.dtype), w_ref[...],
                       preferred_element_type=jnp.float32) + b_ref[...]

    x = x_ref[...]                       # bf16 tile, fed straight into the MXU

    # ---- encoder ----
    h = jnp.tanh(dense(x, ew1, eb1))     # (bt, 128)  bf16 x bf16 -> f32 acc
    h = jnp.tanh(dense(h, ew2, eb2))     # (bt, 64)
    h = jnp.tanh(dense(h, ew3, eb3))     # (bt, 12)
    enc = dense(h, ew4, eb4)             # (bt, 128) lane-dense padded latent (cols 3.. are 0)
    enc_ref[...] = enc.astype(enc_ref.dtype)

    # ---- decoder ----
    h = jnp.tanh(dense(enc, dw1, db1))   # (bt, 12)   padded rows of dw1 are 0 -> exact
    h = jnp.tanh(dense(h, dw2, db2))     # (bt, 64)
    h = jnp.tanh(dense(h, dw3, db3))     # (bt, 128)
    logits = dense(h, dw4, db4)          # (bt, 784)  bf16 x bf16 -> f32 acc
    dec_ref[...] = jax.nn.sigmoid(logits).astype(dec_ref.dtype)


def init_params(key):
    """Deterministic PyTorch-Linear-style init: U(-1/sqrt(fan_in), 1/sqrt(fan_in))."""
    params = []
    for dims in (ENC_DIMS, DEC_DIMS):
        layer_params = []
        for fan_in, fan_out in zip(dims[:-1], dims[1:]):
            key, kw, kb = jax.random.split(key, 3)
            bound = 1.0 / jnp.sqrt(jnp.float32(fan_in))
            w = jax.random.uniform(kw, (fan_in, fan_out), jnp.float32, -bound, bound)
            b = jax.random.uniform(kb, (1, fan_out), jnp.float32, -bound, bound)
            layer_params.append((w, b))
        params.append(layer_params)
    return params  # [encoder_layers, decoder_layers]


@functools.partial(jax.jit, static_argnames=("batch_tile",))
def autoencoder_forward(x, enc_params, dec_params, *, batch_tile=512):
    B, D = x.shape
    assert D == ENC_DIMS[0]
    assert batch_tile % 8 == 0

    # Effective tile: at most `batch_tile`, shrunk (to a sublane multiple) for
    # tiny test batches; pad the batch so it divides evenly.
    bt = min(batch_tile, _round_up(B, 8))
    Bp = _round_up(B, bt)

    # bf16 input halves the dominant HBM read traffic.
    x_in = x.astype(jnp.bfloat16)
    if Bp != B:
        x_in = jnp.pad(x_in, ((0, Bp - B), (0, 0)))

    (ew1, eb1), (ew2, eb2), (ew3, eb3), (ew4, eb4) = enc_params
    (dw1, db1), (dw2, db2), (dw3, db3), (dw4, db4) = dec_params

    # bf16 for the two big 784x128 weight matrices; small weights stay f32.
    ew1 = ew1.astype(jnp.bfloat16)
    dw4 = dw4.astype(jnp.bfloat16)

    # Lane-dense latent: pad 3 -> 128 with zeros (exact math, unmasked stores).
    ew4p = jnp.pad(ew4, ((0, 0), (0, LATENT_PAD - LATENT)))
    eb4p = jnp.pad(eb4, ((0, 0), (0, LATENT_PAD - LATENT)))
    dw1p = jnp.pad(dw1, ((0, LATENT_PAD - LATENT), (0, 0)))

    flat_params = [ew1, eb1, ew2, eb2, ew3, eb3, ew4p, eb4p,
                   dw1p, db1, dw2, db2, dw3, db3, dw4, db4]

    # x / outputs: tile the batch dim; feature dim is the full array extent.
    x_spec = pl.BlockSpec((bt, D), lambda i: (i, 0))
    # Weights / biases: whole array resident in VMEM for every grid step.
    param_specs = [pl.BlockSpec(p.shape, lambda i: (0, 0)) for p in flat_params]
    enc_spec = pl.BlockSpec((bt, LATENT_PAD), lambda i: (i, 0))
    dec_spec = pl.BlockSpec((bt, D), lambda i: (i, 0))

    out_shapes = (
        jax.ShapeDtypeStruct((Bp, LATENT_PAD), jnp.float32),
        jax.ShapeDtypeStruct((Bp, D), jnp.bfloat16),   # bf16 output halves HBM write traffic
    )

    # Advisory cost estimate (helps XLA overlap the custom call).
    flops_per_row = 2 * (784 * 128 + 128 * 64 + 64 * 12 + 12 * LATENT_PAD
                         + LATENT_PAD * 12 + 12 * 64 + 64 * 128 + 128 * 784)
    trans_per_row = 128 + 64 + 12 + 12 + 64 + 128 + 784
    param_bytes = sum(int(p.size) * p.dtype.itemsize for p in flat_params)
    cost = pl.CostEstimate(
        flops=Bp * flops_per_row,
        transcendentals=Bp * trans_per_row,
        bytes_accessed=Bp * (D * 2 + D * 2 + LATENT_PAD * 4) + param_bytes,
    )

    encoded_pad, decoded_pad = pl.pallas_call(
        autoencoder_kernel,
        out_shape=out_shapes,
        grid_spec=pltpu.PrefetchScalarGridSpec(
            num_scalar_prefetch=0,
            grid=(Bp // bt,),
            in_specs=[x_spec] + param_specs,
            out_specs=[enc_spec, dec_spec],
        ),
        compiler_params=pltpu.CompilerParams(
            dimension_semantics=("parallel",),          # megacore sharding on v7x
            vmem_limit_bytes=48 * 1024 * 1024,          # below v7x's 64 MiB physical VMEM
        ),
        cost_estimate=cost,
    )(x_in, *flat_params)

    encoded = encoded_pad[:B, :LATENT]
    decoded = decoded_pad[:B]
    return encoded, decoded


def reference_forward(x, enc_params, dec_params):
    """Pure-JAX f32 reference (matches the PyTorch module)."""
    h = x
    for i, (w, b) in enumerate(enc_params):
        h = h @ w + b
        if i < len(enc_params) - 1:
            h = jnp.tanh(h)
    encoded = h
    h = encoded
    for i, (w, b) in enumerate(dec_params):
        h = h @ w + b
        if i < len(dec_params) - 1:
            h = jnp.tanh(h)
        else:
            h = jax.nn.sigmoid(h)
    return encoded, h


if __name__ == "__main__":
    key = jax.random.PRNGKey(0)
    key, pkey, xkey = jax.random.split(key, 3)

    enc_params, dec_params = init_params(pkey)

    B = 20  # small test batch; also exercises the batch-padding path
    x = jax.random.uniform(xkey, (B, 28 * 28), jnp.float32)  # MNIST-like pixels in [0,1)

    encoded, decoded = autoencoder_forward(x, enc_params, dec_params, batch_tile=512)
    jax.block_until_ready((encoded, decoded))

    # sanity check against a pure-JAX f32 reference (bf16 I/O -> loose tolerance)
    enc_ref, dec_ref = reference_forward(x, enc_params, dec_params)
    assert encoded.shape == (B, LATENT) and decoded.shape == (B, 28 * 28)
    assert jnp.allclose(encoded, enc_ref, atol=5e-2, rtol=5e-2)
    assert jnp.allclose(decoded.astype(jnp.float32), dec_ref, atol=5e-2, rtol=5e-2)

    print("KERNEL_OK")
</pallas_src>

<mosaic_0001>
module attributes {stable_mosaic.version = 11 : i64} {
  func.func @autoencoder_kernel(%arg0: i32, %arg1: memref<24x784xbf16, #tpu.memory_space<vmem>>, %arg2: memref<784x128xbf16, #tpu.memory_space<vmem>>, %arg3: memref<1x128xf32, #tpu.memory_space<vmem>>, %arg4: memref<128x64xf32, #tpu.memory_space<vmem>>, %arg5: memref<1x64xf32, #tpu.memory_space<vmem>>, %arg6: memref<64x12xf32, #tpu.memory_space<vmem>>, %arg7: memref<1x12xf32, #tpu.memory_space<vmem>>, %arg8: memref<12x128xf32, #tpu.memory_space<vmem>>, %arg9: memref<1x128xf32, #tpu.memory_space<vmem>>, %arg10: memref<128x12xf32, #tpu.memory_space<vmem>>, %arg11: memref<1x12xf32, #tpu.memory_space<vmem>>, %arg12: memref<12x64xf32, #tpu.memory_space<vmem>>, %arg13: memref<1x64xf32, #tpu.memory_space<vmem>>, %arg14: memref<64x128xf32, #tpu.memory_space<vmem>>, %arg15: memref<1x128xf32, #tpu.memory_space<vmem>>, %arg16: memref<128x784xbf16, #tpu.memory_space<vmem>>, %arg17: memref<1x784xf32, #tpu.memory_space<vmem>>, %arg18: memref<24x128xf32, #tpu.memory_space<vmem>>, %arg19: memref<24x784xbf16, #tpu.memory_space<vmem>>) attributes {dimension_semantics = [#tpu.dimension_semantics<parallel>], iteration_bounds = array<i64: 1>, scalar_prefetch = 0 : i64, scratch_operands = 0 : i64, tpu.core_type = #tpu.core_type<tc>, window_params = [{transform_indices = @transform_0, window_bounds = array<i64: 24, 784>}, {pipeline_mode = #tpu.pipeline_mode<synchronous>, transform_indices = @transform_1, window_bounds = array<i64: 784, 128>}, {pipeline_mode = #tpu.pipeline_mode<synchronous>, transform_indices = @transform_2, window_bounds = array<i64: 1, 128>}, {pipeline_mode = #tpu.pipeline_mode<synchronous>, transform_indices = @transform_3, window_bounds = array<i64: 128, 64>}, {pipeline_mode = #tpu.pipeline_mode<synchronous>, transform_indices = @transform_4, window_bounds = array<i64: 1, 64>}, {pipeline_mode = #tpu.pipeline_mode<synchronous>, transform_indices = @transform_5, window_bounds = array<i64: 64, 12>}, {pipeline_mode = #tpu.pipeline_mode<synchronous>, transform_indices = @transform_6, window_bounds = array<i64: 1, 12>}, {pipeline_mode = #tpu.pipeline_mode<synchronous>, transform_indices = @transform_7, window_bounds = array<i64: 12, 128>}, {pipeline_mode = #tpu.pipeline_mode<synchronous>, transform_indices = @transform_8, window_bounds = array<i64: 1, 128>}, {pipeline_mode = #tpu.pipeline_mode<synchronous>, transform_indices = @transform_9, window_bounds = array<i64: 128, 12>}, {pipeline_mode = #tpu.pipeline_mode<synchronous>, transform_indices = @transform_10, window_bounds = array<i64: 1, 12>}, {pipeline_mode = #tpu.pipeline_mode<synchronous>, transform_indices = @transform_11, window_bounds = array<i64: 12, 64>}, {pipeline_mode = #tpu.pipeline_mode<synchronous>, transform_indices = @transform_12, window_bounds = array<i64: 1, 64>}, {pipeline_mode = #tpu.pipeline_mode<synchronous>, transform_indices = @transform_13, window_bounds = array<i64: 64, 128>}, {pipeline_mode = #tpu.pipeline_mode<synchronous>, transform_indices = @transform_14, window_bounds = array<i64: 1, 128>}, {pipeline_mode = #tpu.pipeline_mode<synchronous>, transform_indices = @transform_15, window_bounds = array<i64: 128, 784>}, {pipeline_mode = #tpu.pipeline_mode<synchronous>, transform_indices = @transform_16, window_bounds = array<i64: 1, 784>}, {transform_indices = @transform_17, window_bounds = array<i64: 24, 128>}, {transform_indices = @transform_18, window_bounds = array<i64: 24, 784>}]} {
    %c0 = arith.constant 0 : index
    %c0_0 = arith.constant 0 : index
    %0 = vector.load %arg1[%c0, %c0_0] : memref<24x784xbf16, #tpu.memory_space<vmem>>, vector<24x784xbf16>
    %c0_1 = arith.constant 0 : index
    %c0_2 = arith.constant 0 : index
    %1 = vector.load %arg2[%c0_1, %c0_2] : memref<784x128xbf16, #tpu.memory_space<vmem>>, vector<784x128xbf16>
    %cst = arith.constant dense<0.000000e+00> : vector<24x128xf32>
    %2 = tpu.matmul %0, %1, %cst {dimension_numbers = #tpu.dot_dimension_numbers<[1], [0], [0], [1], [0, 0, 1, 1], [], []>} : vector<24x784xbf16>, vector<784x128xbf16>, vector<24x128xf32> -> vector<24x128xf32>
    %c0_3 = arith.constant 0 : index
    %c0_4 = arith.constant 0 : index
    %3 = vector.load %arg3[%c0_3, %c0_4] : memref<1x128xf32, #tpu.memory_space<vmem>>, vector<1x128xf32>
    %4 = vector.broadcast %3 : vector<1x128xf32> to vector<24x128xf32>
    %5 = arith.addf %2, %4 : vector<24x128xf32>
    %6 = math.tanh %5 : vector<24x128xf32>
    %c0_5 = arith.constant 0 : index
    %c0_6 = arith.constant 0 : index
    %7 = vector.load %arg4[%c0_5, %c0_6] : memref<128x64xf32, #tpu.memory_space<vmem>>, vector<128x64xf32>
    %cst_7 = arith.constant dense<0.000000e+00> : vector<24x64xf32>
    %8 = tpu.matmul %6, %7, %cst_7 {dimension_numbers = #tpu.dot_dimension_numbers<[1], [0], [0], [1], [0, 0, 1, 1], [], []>} : vector<24x128xf32>, vector<128x64xf32>, vector<24x64xf32> -> vector<24x64xf32>
    %c0_8 = arith.constant 0 : index
    %c0_9 = arith.constant 0 : index
    %9 = vector.load %arg5[%c0_8, %c0_9] : memref<1x64xf32, #tpu.memory_space<vmem>>, vector<1x64xf32>
    %10 = vector.broadcast %9 : vector<1x64xf32> to vector<24x64xf32>
    %11 = arith.addf %8, %10 : vector<24x64xf32>
    %12 = math.tanh %11 : vector<24x64xf32>
    %c0_10 = arith.constant 0 : index
    %c0_11 = arith.constant 0 : index
    %13 = vector.load %arg6[%c0_10, %c0_11] : memref<64x12xf32, #tpu.memory_space<vmem>>, vector<64x12xf32>
    %cst_12 = arith.constant dense<0.000000e+00> : vector<24x12xf32>
    %14 = tpu.matmul %12, %13, %cst_12 {dimension_numbers = #tpu.dot_dimension_numbers<[1], [0], [0], [1], [0, 0, 1, 1], [], []>} : vector<24x64xf32>, vector<64x12xf32>, vector<24x12xf32> -> vector<24x12xf32>
    %c0_13 = arith.constant 0 : index
    %c0_14 = arith.constant 0 : index
    %15 = vector.load %arg7[%c0_13, %c0_14] : memref<1x12xf32, #tpu.memory_space<vmem>>, vector<1x12xf32>
    %16 = vector.broadcast %15 : vector<1x12xf32> to vector<24x12xf32>
    %17 = arith.addf %14, %16 : vector<24x12xf32>
    %18 = math.tanh %17 : vector<24x12xf32>
    %c0_15 = arith.constant 0 : index
    %c0_16 = arith.constant 0 : index
    %19 = vector.load %arg8[%c0_15, %c0_16] : memref<12x128xf32, #tpu.memory_space<vmem>>, vector<12x128xf32>
    %cst_17 = arith.constant dense<0.000000e+00> : vector<24x128xf32>
    %20 = tpu.matmul %18, %19, %cst_17 {dimension_numbers = #tpu.dot_dimension_numbers<[1], [0], [0], [1], [0, 0, 1, 1], [], []>} : vector<24x12xf32>, vector<12x128xf32>, vector<24x128xf32> -> vector<24x128xf32>
    %c0_18 = arith.constant 0 : index
    %c0_19 = arith.constant 0 : index
    %21 = vector.load %arg9[%c0_18, %c0_19] : memref<1x128xf32, #tpu.memory_space<vmem>>, vector<1x128xf32>
    %22 = vector.broadcast %21 : vector<1x128xf32> to vector<24x128xf32>
    %23 = arith.addf %20, %22 : vector<24x128xf32>
    %c0_20 = arith.constant 0 : index
    %c0_21 = arith.constant 0 : index
    %24 = vector.load %arg18[%c0_20, %c0_21] : memref<24x128xf32, #tpu.memory_space<vmem>>, vector<24x128xf32>
    tpu.vector_store %arg18[%c0_20, %c0_21], %23 {strides = array<i32>} : memref<24x128xf32, #tpu.memory_space<vmem>>, vector<24x128xf32>,
    %c0_22 = arith.constant 0 : index
    %c0_23 = arith.constant 0 : index
    %25 = vector.load %arg10[%c0_22, %c0_23] : memref<128x12xf32, #tpu.memory_space<vmem>>, vector<128x12xf32>
    %cst_24 = arith.constant dense<0.000000e+00> : vector<24x12xf32>
    %26 = tpu.matmul %23, %25, %cst_24 {dimension_numbers = #tpu.dot_dimension_numbers<[1], [0], [0], [1], [0, 0, 1, 1], [], []>} : vector<24x128xf32>, vector<128x12xf32>, vector<24x12xf32> -> vector<24x12xf32>
    %c0_25 = arith.constant 0 : index
    %c0_26 = arith.constant 0 : index
    %27 = vector.load %arg11[%c0_25, %c0_26] : memref<1x12xf32, #tpu.memory_space<vmem>>, vector<1x12xf32>
    %28 = vector.broadcast %27 : vector<1x12xf32> to vector<24x12xf32>
    %29 = arith.addf %26, %28 : vector<24x12xf32>
    %30 = math.tanh %29 : vector<24x12xf32>
    %c0_27 = arith.constant 0 : index
    %c0_28 = arith.constant 0 : index
    %31 = vector.load %arg12[%c0_27, %c0_28] : memref<12x64xf32, #tpu.memory_space<vmem>>, vector<12x64xf32>
    %cst_29 = arith.constant dense<0.000000e+00> : vector<24x64xf32>
    %32 = tpu.matmul %30, %31, %cst_29 {dimension_numbers = #tpu.dot_dimension_numbers<[1], [0], [0], [1], [0, 0, 1, 1], [], []>} : vector<24x12xf32>, vector<12x64xf32>, vector<24x64xf32> -> vector<24x64xf32>
    %c0_30 = arith.constant 0 : index
    %c0_31 = arith.constant 0 : index
    %33 = vector.load %arg13[%c0_30, %c0_31] : memref<1x64xf32, #tpu.memory_space<vmem>>, vector<1x64xf32>
    %34 = vector.broadcast %33 : vector<1x64xf32> to vector<24x64xf32>
    %35 = arith.addf %32, %34 : vector<24x64xf32>
    %36 = math.tanh %35 : vector<24x64xf32>
    %c0_32 = arith.constant 0 : index
    %c0_33 = arith.constant 0 : index
    %37 = vector.load %arg14[%c0_32, %c0_33] : memref<64x128xf32, #tpu.memory_space<vmem>>, vector<64x128xf32>
    %cst_34 = arith.constant dense<0.000000e+00> : vector<24x128xf32>
    %38 = tpu.matmul %36, %37, %cst_34 {dimension_numbers = #tpu.dot_dimension_numbers<[1], [0], [0], [1], [0, 0, 1, 1], [], []>} : vector<24x64xf32>, vector<64x128xf32>, vector<24x128xf32> -> vector<24x128xf32>
    %c0_35 = arith.constant 0 : index
    %c0_36 = arith.constant 0 : index
    %39 = vector.load %arg15[%c0_35, %c0_36] : memref<1x128xf32, #tpu.memory_space<vmem>>, vector<1x128xf32>
    %40 = vector.broadcast %39 : vector<1x128xf32> to vector<24x128xf32>
    %41 = arith.addf %38, %40 : vector<24x128xf32>
    %42 = math.tanh %41 : vector<24x128xf32>
    %43 = arith.truncf %42 : vector<24x128xf32> to vector<24x128xbf16>
    %c0_37 = arith.constant 0 : index
    %c0_38 = arith.constant 0 : index
    %44 = vector.load %arg16[%c0_37, %c0_38] : memref<128x784xbf16, #tpu.memory_space<vmem>>, vector<128x784xbf16>
    %cst_39 = arith.constant dense<0.000000e+00> : vector<24x784xf32>
    %45 = tpu.matmul %43, %44, %cst_39 {dimension_numbers = #tpu.dot_dimension_numbers<[1], [0], [0], [1], [0, 0, 1, 1], [], []>} : vector<24x128xbf16>, vector<128x784xbf16>, vector<24x784xf32> -> vector<24x784xf32>
    %c0_40 = arith.constant 0 : index
    %c0_41 = arith.constant 0 : index
    %46 = vector.load %arg17[%c0_40, %c0_41] : memref<1x784xf32, #tpu.memory_space<vmem>>, vector<1x784xf32>
    %47 = vector.broadcast %46 : vector<1x784xf32> to vector<24x784xf32>
    %48 = arith.addf %45, %47 : vector<24x784xf32>
    %49 = arith.negf %48 : vector<24x784xf32>
    %50 = math.exp %49 : vector<24x784xf32>
    %cst_42 = arith.constant 1.000000e+00 : f32
    %51 = vector.broadcast %cst_42 : f32 to vector<24x784xf32>
    %52 = arith.addf %51, %50 : vector<24x784xf32>
    %53 = arith.divf %51, %52 : vector<24x784xf32>
    %54 = arith.truncf %53 : vector<24x784xf32> to vector<24x784xbf16>
    %c0_43 = arith.constant 0 : index
    %c0_44 = arith.constant 0 : index
    %55 = vector.load %arg19[%c0_43, %c0_44] : memref<24x784xbf16, #tpu.memory_space<vmem>>, vector<24x784xbf16>
    tpu.vector_store %arg19[%c0_43, %c0_44], %54 {strides = array<i32>} : memref<24x784xbf16, #tpu.memory_space<vmem>>, vector<24x784xbf16>,
    return
  }
  func.func @transform_0(%arg0: i32) -> (i32, i32) {
    %c0_i32 = arith.constant 0 : i32
    %c0_i32_0 = arith.constant 0 : i32
    return %arg0, %c0_i32 : i32, i32
  }
  func.func @transform_1(%arg0: i32) -> (i32, i32) {
    %c0_i32 = arith.constant 0 : i32
    %c0_i32_0 = arith.constant 0 : i32
    %c0_i32_1 = arith.constant 0 : i32
    return %c0_i32, %c0_i32_0 : i32, i32
  }
  func.func @transform_2(%arg0: i32) -> (i32, i32) {
    %c0_i32 = arith.constant 0 : i32
    %c0_i32_0 = arith.constant 0 : i32
    %c0_i32_1 = arith.constant 0 : i32
    return %c0_i32, %c0_i32_0 : i32, i32
  }
  func.func @transform_3(%arg0: i32) -> (i32, i32) {
    %c0_i32 = arith.constant 0 : i32
    %c0_i32_0 = arith.constant 0 : i32
    %c0_i32_1 = arith.constant 0 : i32
    return %c0_i32, %c0_i32_0 : i32, i32
  }
  func.func @transform_4(%arg0: i32) -> (i32, i32) {
    %c0_i32 = arith.constant 0 : i32
    %c0_i32_0 = arith.constant 0 : i32
    %c0_i32_1 = arith.constant 0 : i32
    return %c0_i32, %c0_i32_0 : i32, i32
  }
  func.func @transform_5(%arg0: i32) -> (i32, i32) {
    %c0_i32 = arith.constant 0 : i32
    %c0_i32_0 = arith.constant 0 : i32
    %c0_i32_1 = arith.constant 0 : i32
    return %c0_i32, %c0_i32_0 : i32, i32
  }
  func.func @transform_6(%arg0: i32) -> (i32, i32) {
    %c0_i32 = arith.constant 0 : i32
    %c0_i32_0 = arith.constant 0 : i32
    %c0_i32_1 = arith.constant 0 : i32
    return %c0_i32, %c0_i32_0 : i32, i32
  }
  func.func @transform_7(%arg0: i32) -> (i32, i32) {
    %c0_i32 = arith.constant 0 : i32
    %c0_i32_0 = arith.constant 0 : i32
    %c0_i32_1 = arith.constant 0 : i32
    return %c0_i32, %c0_i32_0 : i32, i32
  }
  func.func @transform_8(%arg0: i32) -> (i32, i32) {
    %c0_i32 = arith.constant 0 : i32
    %c0_i32_0 = arith.constant 0 : i32
    %c0_i32_1 = arith.constant 0 : i32
    return %c0_i32, %c0_i32_0 : i32, i32
  }
  func.func @transform_9(%arg0: i32) -> (i32, i32) {
    %c0_i32 = arith.constant 0 : i32
    %c0_i32_0 = arith.constant 0 : i32
    %c0_i32_1 = arith.constant 0 : i32
    return %c0_i32, %c0_i32_0 : i32, i32
  }
  func.func @transform_10(%arg0: i32) -> (i32, i32) {
    %c0_i32 = arith.constant 0 : i32
    %c0_i32_0 = arith.constant 0 : i32
    %c0_i32_1 = arith.constant 0 : i32
    return %c0_i32, %c0_i32_0 : i32, i32
  }
  func.func @transform_11(%arg0: i32) -> (i32, i32) {
    %c0_i32 = arith.constant 0 : i32
    %c0_i32_0 = arith.constant 0 : i32
    %c0_i32_1 = arith.constant 0 : i32
    return %c0_i32, %c0_i32_0 : i32, i32
  }
  func.func @transform_12(%arg0: i32) -> (i32, i32) {
    %c0_i32 = arith.constant 0 : i32
    %c0_i32_0 = arith.constant 0 : i32
    %c0_i32_1 = arith.constant 0 : i32
    return %c0_i32, %c0_i32_0 : i32, i32
  }
  func.func @transform_13(%arg0: i32) -> (i32, i32) {
    %c0_i32 = arith.constant 0 : i32
    %c0_i32_0 = arith.constant 0 : i32
    %c0_i32_1 = arith.constant 0 : i32
    return %c0_i32, %c0_i32_0 : i32, i32
  }
  func.func @transform_14(%arg0: i32) -> (i32, i32) {
    %c0_i32 = arith.constant 0 : i32
    %c0_i32_0 = arith.constant 0 : i32
    %c0_i32_1 = arith.constant 0 : i32
    return %c0_i32, %c0_i32_0 : i32, i32
  }
  func.func @transform_15(%arg0: i32) -> (i32, i32) {
    %c0_i32 = arith.constant 0 : i32
    %c0_i32_0 = arith.constant 0 : i32
    %c0_i32_1 = arith.constant 0 : i32
    return %c0_i32, %c0_i32_0 : i32, i32
  }
  func.func @transform_16(%arg0: i32) -> (i32, i32) {
    %c0_i32 = arith.constant 0 : i32
    %c0_i32_0 = arith.constant 0 : i32
    %c0_i32_1 = arith.constant 0 : i32
    return %c0_i32, %c0_i32_0 : i32, i32
  }
  func.func @transform_17(%arg0: i32) -> (i32, i32) {
    %c0_i32 = arith.constant 0 : i32
    %c0_i32_0 = arith.constant 0 : i32
    return %arg0, %c0_i32 : i32, i32
  }
  func.func @transform_18(%arg0: i32) -> (i32, i32) {
    %c0_i32 = arith.constant 0 : i32
    %c0_i32_0 = arith.constant 0 : i32
    return %arg0, %c0_i32 : i32, i32
  }
}

</mosaic_0001>

<bundles_post_ra>
// kernel: autoencoder_forward.1
= control target key start
LH: loop header
LB: loop body
LE: loop exit
PB: predicated region body
PF: predicated region fallthrough
CT: control target
= control target key end

     0   :  { %s3870_s0 = inlined_call_operand.vmem [shape: bf16[24,784], index: 0, kind: input, shape index: {}]   ;;  %s3871_s1 = inlined_call_operand.vmem [shape: bf16[784,128], index: 1, kind: input, shape index: {}]   ;;  %s3872_s2 = inlined_call_operand.vmem [shape: f32[1,128], index: 2, kind: input, shape index: {}]   ;;  %s3873_s3 = inlined_call_operand.vmem [shape: f32[128,64], index: 3, kind: input, shape index: {}]   ;;  %s3874_s4 = inlined_call_operand.vmem [shape: f32[1,64], index: 4, kind: input, shape index: {}]   ;;  %s3875_s5 = inlined_call_operand.vmem [shape: f32[64,12], index: 5, kind: input, shape index: {}]   ;;  %s3876_s6 = inlined_call_operand.vmem [shape: f32[1,12], index: 6, kind: input, shape index: {}]   ;;  %s3877_s7 = inlined_call_operand.vmem [shape: f32[12,128], index: 7, kind: input, shape index: {}]   ;;  %s3878_s8 = inlined_call_operand.vmem [shape: f32[1,128], index: 8, kind: input, shape index: {}]   ;;  %s3879_s9 = inlined_call_operand.vmem [shape: f32[128,12], index: 9, kind: input, shape index: {}]   ;;  %s3880_s10 = inlined_call_operand.vmem [shape: f32[1,12], index: 10, kind: input, shape index: {}]   ;;  %s3881_s11 = inlined_call_operand.vmem [shape: f32[12,64], index: 11, kind: input, shape index: {}]   ;;  %s3882_s12 = inlined_call_operand.vmem [shape: f32[1,64], index: 12, kind: input, shape index: {}]   ;;  %s3883_s13 = inlined_call_operand.vmem [shape: f32[64,128], index: 13, kind: input, shape index: {}]   ;;  %s3884_s14 = inlined_call_operand.vmem [shape: f32[1,128], index: 14, kind: input, shape index: {}]   ;;  %s3885_s15 = inlined_call_operand.vmem [shape: bf16[128,784], index: 15, kind: input, shape index: {}]   ;;  %s3886_s16 = inlined_call_operand.vmem [shape: f32[1,784], index: 16, kind: input, shape index: {}]   ;;  %s3887_s17 = inlined_call_operand.vmem [shape: f32[24,128], index: 17, kind: output, shape index: {0}]   ;;  %s3888_s18 = inlined_call_operand.hbm [shape: bf16[24,784], index: 18, kind: output, shape index: {1}]  }
   0x1   :  { %3891 = sst [smem:[#allocation5_spill]] %s3870_s0 }
   0x2   :  { %3892 = sst [smem:[#allocation6_spill]] %s3871_s1 }
   0x3   :  { %3893 = sst [smem:[#allocation7_spill]] %s3872_s2 }
   0x4   :  { %s3894_s29 = sld [smem:[#allocation6_spill]]  ;;  %s3895_s22 = sld [smem:[#allocation5_spill]]  ;;  %vm530_vm0 = vcmask 130048  }
   0xa   :  { %v2819_v0 = vld [vmem:[%s3894_s29 + $0x40] sm:$0xff]   ;;  %v2823_v4 = vld [vmem:[%s3894_s29 + $0x48] sm:$0xff]   ;;  %v2827_v8 = vld [vmem:[%s3894_s29 + $0x50] sm:$0xff]  }
   0xb   :  { %v2820_v1 = vld [vmem:[%s3894_s29] sm:$0xff]   ;;  %2380 = vmatprep.subr.bf16.mxu0 %v2819_v0  ;;  %v2824_v5 = vld [vmem:[%s3894_s29 + $0x8] sm:$0xff]   ;;  %v2828_v9 = vld [vmem:[%s3894_s29 + $0x10] sm:$0xff]  }
   0xc   :  { %v2821_v2 = vld [vmem:[%s3894_s29 + $0xc0] sm:$0xff]   ;;  %2381 = vmatpush3.bf16.msra.mxu0 %v2820_v1  ;;  %v2825_v6 = vld [vmem:[%s3894_s29 + $0xc8] sm:$0xff]   ;;  %v2829_v10 = vld [vmem:[%s3894_s29 + $0xd0] sm:$0xff]  }
   0xd   :  { %v2822_v3 = vld [vmem:[%s3894_s29 + $0x80] sm:$0xff]   ;;  %2408 = vmatprep.subr.bf16.mxu1 %v2821_v2  ;;  %2382 = vmatprep.subr.bf16.mxu0 %v2823_v4  ;;  %v2826_v7 = vld [vmem:[%s3894_s29 + $0x88] sm:$0xff]   ;;  %v2830_v11 = vld [vmem:[%s3894_s29 + $0x90] sm:$0xff]  }
   0xe   :  { %2409 = vmatpush3.bf16.msra.mxu1 %v2822_v3  ;;  %v2831_v12 = vld [vmem:[%s3894_s29 + $0x58] sm:$0xff]   ;;  %v2835_v16 = vld [vmem:[%s3894_s29 + $0x60] sm:$0xff]   ;;  %v2839_v20 = vld [vmem:[%s3894_s29 + $0x68] sm:$0xff]  }
   0xf   :  { %2410 = vmatprep.subr.bf16.mxu1 %v2825_v6  ;;  %v2832_v13 = vld [vmem:[%s3894_s29 + $0x18] sm:$0xff]   ;;  %v2836_v17 = vld [vmem:[%s3894_s29 + $0x20] sm:$0xff]   ;;  %v2840_v21 = vld [vmem:[%s3894_s29 + $0x28] sm:$0xff]  }
  0x10   :  { %2383 = vmatpush3.bf16.msra.mxu0 %v2824_v5  ;;  %v2833_v14 = vld [vmem:[%s3894_s29 + $0xd8] sm:$0xff]   ;;  %v2837_v18 = vld [vmem:[%s3894_s29 + $0xe0] sm:$0xff]   ;;  %v2841_v22 = vld [vmem:[%s3894_s29 + $0xe8] sm:$0xff]  }
  0x11   :  { %2384 = vmatprep.subr.bf16.mxu0 %v2827_v8  ;;  %v2834_v15 = vld [vmem:[%s3894_s29 + $0x98] sm:$0xff]   ;;  %v2838_v19 = vld [vmem:[%s3894_s29 + $0xa0] sm:$0xff]   ;;  %v2842_v23 = vld [vmem:[%s3894_s29 + $0xa8] sm:$0xff]  }
  0x12   :  { %2411 = vmatpush3.bf16.msra.mxu1 %v2826_v7  ;;  %v2843_v24 = vld [vmem:[%s3894_s29 + $0x70] sm:$0xff]   ;;  %v2847_v28 = vld [vmem:[%s3894_s29 + $0x78] sm:$0xff]   ;;  %v2852_v32 = vld [vmem:[%s3895_s22 + $0x4] ss:$28 sps:$4 sm:$0xff]  }
  0x13   :  { %2412 = vmatprep.subr.bf16.mxu1 %v2829_v10  ;;  %v2844_v25 = vld [vmem:[%s3894_s29 + $0x30] sm:$0xff]   ;;  %v2848_v29 = vld [vmem:[%s3894_s29 + $0x38] sm:$0xff]   ;;  %569 = vmatprep.mubr.bf16.mxu0 %v2852_v32  ;;  %v2854_v34 = vld [vmem:[%s3894_s29 + $0x140] sm:$0xff]  }
  0x14   :  { %2385 = vmatpush3.bf16.msra.mxu0 %v2828_v9  ;;  %v2845_v26 = vld [vmem:[%s3894_s29 + $0xf0] sm:$0xff]   ;;  %v2849_v30 = vld [vmem:[%s3894_s29 + $0xf8] sm:$0xff]   ;;  %v2855_v35 = vld [vmem:[%s3895_s22 + $0x8] ss:$28 sps:$4 sm:$0xff]  }
  0x15   :  { %2386 = vmatprep.subr.bf16.mxu0 %v2831_v12  ;;  %v2846_v27 = vld [vmem:[%s3894_s29 + $0xb0] sm:$0xff]   ;;  %v2850_v31 = vld [vmem:[%s3895_s22] ss:$28 sps:$4 sm:$0xff]   ;;  %v2857_v36 = vld [vmem:[%s3895_s22 + $0xc] ss:$28 sps:$4 sm:$0xff]  }
  0x16   :  { %2413 = vmatpush3.bf16.msra.mxu1 %v2830_v11  ;;  %v2853_v33 = vld [vmem:[%s3894_s29 + $0xb8] sm:$0xff]   ;;  %v2858_v37 = vld [vmem:[%s3894_s29 + $0x100] sm:$0xff]   ;;  %617 = vmatprep.mubr.bf16.mxu1 %v2857_v36  ;;  %v2859_v38 = vld [vmem:[%s3894_s29 + $0x148] sm:$0xff]  }
  0x17   :  { %2414 = vmatprep.subr.bf16.mxu1 %v2833_v14  ;;  %v2860_v39 = vld [vmem:[%s3894_s29 + $0x108] sm:$0xff]   ;;  %v2861_v40 = vld [vmem:[%s3894_s29 + $0x150] sm:$0xff]   ;;  %v2863_v42 = vld [vmem:[%s3894_s29 + $0x158] sm:$0xff]  }
  0x18   :  { %2387 = vmatpush3.bf16.msra.mxu0 %v2832_v13  ;;  %v2862_v41 = vld [vmem:[%s3894_s29 + $0x110] sm:$0xff]   ;;  %v2867_v43 = vld [vmem:[%s3894_s29 + $0x180] sm:$0xff]   ;;  %v68_v44 = vld [vmem:[%s3895_s22 + $0x38] sm:$0xff] }
  0x19   :  { %2388 = vmatprep.subr.bf16.mxu0 %v2835_v16  ;;  %v2864_v45 = vld [vmem:[%s3894_s29 + $0x118] sm:$0xff]   ;;  %v2202_v46 = vcombine.high %v68_v44, %v68_v44  ;;  %v2201_v47 = vcombine.low %v68_v44, %v68_v44  ;;  %v2865_v48 = vld [vmem:[%s3894_s29 + $0x160] sm:$0xff]   ;;  %v2869_v53 = vld [vmem:[%s3894_s29 + $0x168] sm:$0xff]  }
  0x1a   :  { %2415 = vmatpush3.bf16.msra.mxu1 %v2834_v15  ;;  %v69_v49 = vld [vmem:[%s3895_s22 + $0x40] sm:$0xff]  ;;  %v2871_v54 = vld [vmem:[%s3894_s29 + $0x128] sm:$0xff]   ;;  %v2880_v55 = vld [vmem:[%s3895_s22 + $0x14] ss:$28 sps:$4 sm:$0xff]  }
  0x1b   :  { %2416 = vmatprep.subr.bf16.mxu1 %v2837_v18  ;;  %v2204_v50 = vcombine.high %v69_v49, %v69_v49  ;;  %v2203_v51 = vcombine.low %v69_v49, %v69_v49  ;;  %v2866_v52 = vld [vmem:[%s3894_s29 + $0x120] sm:$0xff]   ;;  %v2881_v56 = vld [vmem:[%s3895_s22 + $0x18] ss:$28 sps:$4 sm:$0xff]   ;;  %v2882_v58 = vld [vmem:[%s3895_s22 + $0x50] ss:$0 sps:$4 sm:$0xff]  }
  0x1c   :  { %2389 = vmatpush3.bf16.msra.mxu0 %v2836_v17  ;;  %v2873_v57 = vld [vmem:[%s3894_s29 + $0x170] sm:$0xff]   ;;  %v2876_v60 = vld [vmem:[%s3894_s29 + $0x178] sm:$0xff]   ;;  %v70_v62 = vld [vmem:[%s3895_s22 + $0x48] sm:$0xff] }
  0x1d   :  { %2390 = vmatprep.subr.bf16.mxu0 %v2839_v20  ;;  %v2875_v59 = vld [vmem:[%s3894_s29 + $0x130] sm:$0xff]   ;;  %v2877_v61 = vld [vmem:[%s3894_s29 + $0x138] sm:$0xff]   ;;  %v2206_v0 = vcombine.high %v70_v62, %v70_v62  ;;  %v2205_v1 = vcombine.low %v70_v62, %v70_v62 }
  0x1e   :  { %2417 = vmatpush3.bf16.msra.mxu1 %v2838_v19  ;;  %v2878_v63 = vld [vmem:[%s3895_s22 + $0x10] ss:$28 sps:$4 sm:$0xff]  }
  0x1f   :  { %2418 = vmatprep.subr.bf16.mxu1 %v2841_v22 }
  0x20   :  { %2391 = vmatpush3.bf16.msra.mxu0 %v2840_v21 }
  0x21   :  { %2392 = vmatprep.subr.bf16.mxu0 %v2843_v24 }
  0x22   :  { %2419 = vmatpush3.bf16.msra.mxu1 %v2842_v23 }
  0x23   :  { %2420 = vmatprep.subr.bf16.mxu1 %v2845_v26 }
  0x24   :  { %2393 = vmatpush3.bf16.msra.mxu0 %v2844_v25 }
  0x25   :  { %2394 = vmatprep.subr.bf16.mxu0 %v2847_v28 }
  0x26   :  { %2421 = vmatpush3.bf16.msra.mxu1 %v2846_v27 }
  0x27   :  { %2422 = vmatprep.subr.bf16.mxu1 %v2849_v30 }
  0x28   :  { %2395 = vmatpush3.bf16.msra.mxu0 %v2848_v29 }
  0x29   :  { %2436 = vmatprep.subr.bf16.mxu0 %v2854_v34 }
  0x2a   :  { %2423 = vmatpush3.bf16.msra.mxu1 %v2853_v33 }
  0x2b   :  { %570 = vmatmul.mubr.bf16.vlgmr.msra.gmra.mrb[0].mxu0 %v2850_v31  ;;  %2547 = vmatprep.subr.bf16.mxu1 %v2867_v43 }
  0x2c   :  { %2437 = vmatpush3.bf16.msra.mxu0 %v2858_v37  ;;  %577 = vmatprep.mubr.bf16.mxu0 %v2202_v46 }
  0x2d   :  { %618 = vmatmul.mubr.bf16.vlgmr.msra.gmra.mrb[0].mxu1 %v2855_v35  ;;  %2438 = vmatprep.subr.bf16.mxu0 %v2859_v38 }
  0x2e   :  { %2548 = vmatpush3.bf16.msra.mxu1 %v2867_v43  ;;  %625 = vmatprep.mubr.bf16.mxu1 %v2204_v50 }
  0x30   :  { %2439 = vmatpush3.bf16.msra.mxu0 %v2860_v39 }
  0x31   :  { %2440 = vmatprep.subr.bf16.mxu0 %v2861_v40 }
  0x33   :  { %578 = vmatmul.mubr.bf16.gmra.mrb[4].mxu0 %v2201_v47 }
  0x34   :  { %2441 = vmatpush3.bf16.msra.mxu0 %v2862_v41  ;;  %665 = vmatprep.mubr.bf16.mxu0 %v2880_v55 }
  0x35   :  { %2442 = vmatprep.subr.bf16.mxu0 %v2863_v42  ;;  %626 = vmatmul.mubr.bf16.gmra.mrb[4].mxu1 %v2203_v51 }
  0x36   :  { %2549 = vmatprep.mubr.msk.bf16.mxu1 %vm530_vm0, %v2881_v56 }
  0x38   :  { %2443 = vmatpush3.bf16.msra.mxu0 %v2864_v45 }
  0x39   :  { %2444 = vmatprep.subr.bf16.mxu0 %v2865_v48 }
  0x3c   :  { %2445 = vmatpush3.bf16.msra.mxu0 %v2866_v52 }
  0x3d   :  { %2446 = vmatprep.subr.bf16.mxu0 %v2869_v53  ;;  %2550 = vmatmul.mubr.msk.bf16.vlgmr.msra.gmra.mrb[8].mxu1 %vm530_vm0, %v2882_v58 }
  0x40   :  { %2447 = vmatpush3.bf16.msra.mxu0 %v2871_v54 }
  0x41   :  { %2448 = vmatprep.subr.bf16.mxu0 %v2873_v57 }
  0x44   :  { %2449 = vmatpush3.bf16.msra.mxu0 %v2875_v59 }
  0x45   :  { %2450 = vmatprep.subr.bf16.mxu0 %v2876_v60 }
  0x48   :  { %2451 = vmatpush3.bf16.msra.mxu0 %v2877_v61 }
  0x4b   :  { %666 = vmatmul.mubr.bf16.vlgmr.msra.gmra.mrb[8].mxu0 %v2878_v63 }
  0x4c   :  { %673 = vmatprep.mubr.bf16.mxu0 %v2206_v0 }
  0x53   :  { %674 = vmatmul.mubr.bf16.gmra.mrb[12].mxu0 %v2205_v1 }
  0x54   :  { %24 = vsyncpa [#allocation3], 0  ;;  %v732_v2 = vld [vmem:[%s3873_s3] sm:$0xff]  ;;  %v733_v3 = vld [vmem:[%s3873_s3 + $0x8] sm:$0xff]  ;;  %v3109_v4 = vmov 0.0|0.0   ;;  %vm3110_vm1 = vmmov 0  }
  0x55   :  { %2731 = vmatprep.subr.bf16.mxu1 %v3109_v4  ;;  %v2732_v5 = vpack.c.bf16 %v733_v3, %v732_v2  ;;  %2755 = vmatprep.subr.bf16.mxu0 %v3109_v4  ;;  %v734_v6 = vld [vmem:[%s3873_s3 + $0x10] sm:$0xff]  ;;  %v735_v7 = vld [vmem:[%s3873_s3 + $0x18] sm:$0xff]  ;;  %v736_v9 = vld [vmem:[%s3873_s3 + $0x20] sm:$0xff]  ;;  %v3111_v27 = vmov 0.0   ;;  %s3896_s19 = sld [smem:[#allocation7_spill]]  ;;  %vm853_vm2 = vcmask 523264  }
  0x56   :  { %v2735_v8 = vpack.c.bf16 %v735_v7, %v734_v6  ;;  %v737_v10 = vld [vmem:[%s3873_s3 + $0x28] sm:$0xff]  ;;  %v738_v12 = vld [vmem:[%s3873_s3 + $0x30] sm:$0xff]  ;;  %v739_v13 = vld [vmem:[%s3873_s3 + $0x38] sm:$0xff]  ;;  %2585 = vmatprep.mubr.msk.f32.mxu1 %vm3110_vm1, %v3111_v27  ;;  %2610 = vmatprep.mubr.msk.f32.mxu0 %vm3110_vm1, %v3111_v27  ;;  %vm965_vm3 = vcmask 1043456   ;;  %vm3112_vm4 = vmmov 1   ;;  %vm955_vm6 = vcmask 97280  }
  0x57   :  { %2733 = vmatpush3.bf16.msra.mxu1 %v2732_v5  ;;  %v2738_v11 = vpack.c.bf16 %v737_v10, %v736_v9  ;;  %v2741_v14 = vpack.c.bf16 %v739_v13, %v738_v12  ;;  %v740_v15 = vld [vmem:[%s3873_s3 + $0x40] sm:$0xff]  ;;  %v741_v16 = vld [vmem:[%s3873_s3 + $0x48] sm:$0xff]  ;;  %v742_v18 = vld [vmem:[%s3873_s3 + $0x50] sm:$0xff]  ;;  %vm2163_vm7 = vcmask 125952  }
  0x58   :  { %2734 = vmatprep.subr.bf16.mxu1 %v3109_v4  ;;  %v2744_v17 = vpack.c.bf16 %v741_v16, %v740_v15  ;;  %v743_v19 = vld [vmem:[%s3873_s3 + $0x58] sm:$0xff]  ;;  %v744_v21 = vld [vmem:[%s3873_s3 + $0x60] sm:$0xff]  ;;  %v745_v22 = vld [vmem:[%s3873_s3 + $0x68] sm:$0xff] }
  0x59   :  { %v2747_v20 = vpack.c.bf16 %v743_v19, %v742_v18  ;;  %v2750_v23 = vpack.c.bf16 %v745_v22, %v744_v21  ;;  %v746_v24 = vld [vmem:[%s3873_s3 + $0x70] sm:$0xff]  ;;  %v747_v25 = vld [vmem:[%s3873_s3 + $0x78] sm:$0xff]  ;;  %v838_v28 = vld [vmem:[%s3875_s5] sm:$0xff] }
  0x5a   :  { %v2753_v26 = vpack.c.bf16 %v747_v25, %v746_v24  ;;  %v839_v29 = vld [vmem:[%s3875_s5 + $0x8] sm:$0xff]  ;;  %v840_v21 = vld [vmem:[%s3875_s5 + $0x10] sm:$0xff]  ;;  %v841_v22 = vld [vmem:[%s3875_s5 + $0x18] sm:$0xff] }
  0x5b   :  { %2736 = vmatpush3.bf16.msra.mxu1 %v2735_v8  ;;  %v2756_v30 = vpack.c.bf16 %v839_v29, %v838_v28  ;;  %v2193_v32 = vld [vmem:[%s3896_s19] ss:$0 sm:$0xff]  ;;  %v843_v25 = vld [vmem:[%s3875_s5 + $0x28] sm:$0xff]  ;;  %v844_v28 = vld [vmem:[%s3875_s5 + $0x30] sm:$0xff] }
  0x5c   :  { %2737 = vmatprep.subr.bf16.mxu1 %v3109_v4  ;;  %v842_v24 = vld [vmem:[%s3875_s5 + $0x20] sm:$0xff]  ;;  %v845_v29 = vld [vmem:[%s3875_s5 + $0x38] sm:$0xff]  ;;  %vm3509_vm5 = vmpackc.low %vm965_vm3, %vm3112_vm4 }
  0x5d   :  { %2757 = vmatpush3.bf16.msra.mxu0 %v2756_v30  ;;  %v2765_v30 = vpack.c.bf16 %v845_v29, %v844_v28 }
  0x5e   :  { %2758 = vmatprep.subr.bf16.mxu0 %v3109_v4 }
  0x5f   :  { %2739 = vmatpush3.bf16.msra.mxu1 %v2738_v11 }
  0x60   :  { %2740 = vmatprep.subr.bf16.mxu1 %v3109_v4 }
  0x63   :  { %2742 = vmatpush3.bf16.msra.mxu1 %v2741_v14 }
  0x64   :  { %2743 = vmatprep.subr.bf16.mxu1 %v3109_v4 }
  0x67   :  { %2745 = vmatpush3.bf16.msra.mxu1 %v2744_v17 }
  0x68   :  { %2746 = vmatprep.subr.bf16.mxu1 %v3109_v4 }
  0x6b   :  { %2748 = vmatpush3.bf16.msra.mxu1 %v2747_v20 }
  0x6c   :  { %2749 = vmatprep.subr.bf16.mxu1 %v3109_v4 }
  0x6f   :  { %2751 = vmatpush3.bf16.msra.mxu1 %v2750_v23  ;;  %v2759_v23 = vpack.c.bf16 %v841_v22, %v840_v21  ;;  %v2264_v22 = vld [vmem:[%s3878_s8] ss:$0 sm:$0xff] }
  0x70   :  { %2752 = vmatprep.subr.bf16.mxu1 %v3109_v4 }
  0x71   :  { %2760 = vmatpush3.bf16.msra.mxu0 %v2759_v23 }
  0x72   :  { %2761 = vmatprep.subr.bf16.mxu0 %v3109_v4 }
  0x73   :  { %2754 = vmatpush3.bf16.msra.mxu1 %v2753_v26  ;;  %v2762_v26 = vpack.c.bf16 %v843_v25, %v842_v24 }
  0x74   :  { %2771 = vmatprep.subr.bf16.mxu1 %v3109_v4 }
  0x75   :  { %2763 = vmatpush3.bf16.msra.mxu0 %v2762_v26 }
  0x76   :  { %2764 = vmatprep.subr.bf16.mxu0 %v3109_v4 }
  0x79   :  { %2766 = vmatpush3.bf16.msra.mxu0 %v2765_v30 }
  0x7a   :  { %2767 = vmatprep.subr.bf16.mxu0 %v3109_v4 }
  0xfe   :  { %v2396_v31 = vpop.f32.mrb[0].mxu0 }
  0xff   :  { %v2397_v33 = vpop.f32.mrb[1].mxu0 }
 0x100   :  { %v2398_v34 = vadd.f32 %v2397_v33, %v2396_v31  ;;  %v2399_v35 = vpop.f32.mrb[2].mxu0  ;;  %v2424_v36 = vpop.f32.mrb[0].mxu1  ;;  %v2259_v31 = vld [vmem:[%s3874_s4] ss:$0 sm:$0xff] }
 0x101   :  { %v2400_v37 = vpop.f32.mrb[3].mxu0  ;;  %v2425_v40 = vpop.f32.mrb[1].mxu1 }
 0x102   :  { %v572_v38 = vadd.f32 %v2398_v34, %v2193_v32  ;;  %v2401_v39 = vadd.f32 %v2400_v37, %v2399_v35  ;;  %v2426_v41 = vadd.f32 %v2425_v40, %v2424_v36  ;;  %v2427_v42 = vpop.f32.mrb[2].mxu1 }
 0x103   :  { %v2428_v44 = vpop.f32.mrb[3].mxu1 }
 0x104   :  { %v575_v43 = vadd.f32 %v2401_v39, %v2193_v32  ;;  %v620_v45 = vadd.f32 %v2426_v41, %v572_v38  ;;  %v2429_v46 = vadd.f32 %v2428_v44, %v2427_v42  ;;  %v946_v44 = vld [vmem:[%s3877_s7] sm:$0xff] }
 0x106   :  { %v623_v47 = vadd.f32 %v2429_v46, %v575_v43  ;;  %v2402_v48 = vpop.f32.mrb[4].mxu0 }
 0x107   :  { %v2403_v49 = vpop.f32.mrb[5].mxu0 }
 0x108   :  { %v2404_v50 = vadd.f32 %v2403_v49, %v2402_v48  ;;  %v2405_v51 = vpop.f32.mrb[6].mxu0  ;;  %v2430_v53 = vpop.f32.mrb[4].mxu1  ;;  %v1052_v48 = vld [vmem:[%s3879_s9] sm:$0xff]  ;;  %v1053_v49 = vld [vmem:[%s3879_s9 + $0x8] sm:$0xff] }
 0x109   :  { %v2406_v52 = vpop.f32.mrb[7].mxu0  ;;  %v2431_v55 = vpop.f32.mrb[5].mxu1  ;;  %v2772_v51 = vpack.c.bf16 %v1053_v49, %v1052_v48 }
 0x10a   :  { %v580_v54 = vadd.f32 %v2404_v50, %v2193_v32  ;;  %v2432_v56 = vadd.f32 %v2431_v55, %v2430_v53  ;;  %v2433_v57 = vpop.f32.mrb[6].mxu1  ;;  %v1054_v50 = vld [vmem:[%s3879_s9 + $0x10] sm:$0xff]  ;;  %v1055_v52 = vld [vmem:[%s3879_s9 + $0x18] sm:$0xff]  ;;  %v1057_v55 = vld [vmem:[%s3879_s9 + $0x28] sm:$0xff] }
 0x10b   :  { %v2434_v58 = vpop.f32.mrb[7].mxu1  ;;  %v2775_v53 = vpack.c.bf16 %v1055_v52, %v1054_v50  ;;  %v1058_v57 = vld [vmem:[%s3879_s9 + $0x30] sm:$0xff] }
 0x10c   :  { %v628_v59 = vadd.f32 %v2432_v56, %v580_v54  ;;  %v1056_v54 = vld [vmem:[%s3879_s9 + $0x20] sm:$0xff]  ;;  %v1059_v58 = vld [vmem:[%s3879_s9 + $0x38] sm:$0xff]  ;;  %v1264_v52 = vld [vmem:[%s3883_s13 + $0x10] sm:$0xff] }
 0x10d   :  { %v2778_v56 = vpack.c.bf16 %v1057_v55, %v1056_v54  ;;  %v1266_v55 = vld [vmem:[%s3883_s13 + $0x20] sm:$0xff] }
 0x110   :  { %v2551_v60 = vpop.f32.mrb[8].mxu1 }
 0x111   :  { %v715_v61 = vpop.f32.mrb[9].mxu1 }
 0x112   :  { %v2552_v62 = vpop.f32.mrb[10].mxu1 }
 0x113   :  { %v718_v63 = vpop.f32.mrb[11].mxu1 }
 0x11e   :  { %v2452_v0 = vpop.f32.mrb[8].mxu0 }
 0x11f   :  { %v2453_v1 = vpop.f32.mrb[9].mxu0 }
 0x120   :  { %v2454_v2 = vadd.f32 %v2453_v1, %v2452_v0  ;;  %v2455_v3 = vpop.f32.mrb[10].mxu0  ;;  %v1063_v0 = vld [vmem:[%s3879_s9 + $0x58] sm:$0xff] }
 0x121   :  { %v2456_v5 = vpop.f32.mrb[11].mxu0 }
 0x122   :  { %v668_v6 = vadd.f32 %v2454_v2, %v620_v45  ;;  %v2457_v7 = vadd.f32 %v2456_v5, %v2455_v3  ;;  %v947_v45 = vld [vmem:[%s3877_s7 + $0x8] sm:$0xf]  ;;  %v1064_v2 = vld [vmem:[%s3879_s9 + $0x60] sm:$0xff] }
 0x123   :  { %v2768_v46 = vpack.c.bf16 %v947_v45, %v946_v44  ;;  %v1065_v3 = vld [vmem:[%s3879_s9 + $0x68] sm:$0xff]  ;;  %v1262_v44 = vld [vmem:[%s3883_s13] sm:$0xff] }
 0x124   :  { %v716_v8 = vadd.f32 %v715_v61, %v668_v6  ;;  %v671_v9 = vadd.f32 %v2457_v7, %v623_v47  ;;  %v1061_v61 = vld [vmem:[%s3879_s9 + $0x48] sm:$0xff]  ;;  %v2790_v5 = vpack.c.bf16 %v1065_v3, %v1064_v2  ;;  %v2260_v6 = vld [vmem:[%s3876_s6] ss:$0 sm:$0xff] }
 0x125   :  { %v1263_v45 = vld [vmem:[%s3883_s13 + $0x8] sm:$0xff] }
 0x126   :  { %2965 = vtanh.f32 %v716_v8  ;;  %v719_v10 = vadd.f32 %v718_v63, %v671_v9  ;;  %v2458_v11 = vpop.f32.mrb[12].mxu0  ;;  %v1062_v63 = vld [vmem:[%s3879_s9 + $0x50] sm:$0xff]  ;;  %v2800_v48 = vpack.c.bf16 %v1263_v45, %v1262_v44  ;;  %v2905_v3 = vld [vmem:[%s3885_s15 + $0xac] ss:$28 sps:$4 sm:$0xff]   ;;  %v3113_v44 = vmov 0  }
 0x127   :  { %v2459_v12 = vpop.f32.mrb[13].mxu0  ;;  %v2787_v1 = vpack.c.bf16 %v1063_v0, %v1062_v63  ;;  %v2893_v63 = vld [vmem:[%s3885_s15 + $0x3c] ss:$28 sps:$4 sm:$0xff]   ;;  %v2897_v2 = vld [vmem:[%s3885_s15 + $0x70] ss:$28 sps:$4 sm:$0xff]  }
 0x128   :  { %v2460_v13 = vadd.f32 %v2459_v12, %v2458_v11  ;;  %v2461_v14 = vpop.f32.mrb[14].mxu0  ;;  %2967 = vtanh.f32 %v719_v10  ;;  %v2891_v0 = vld [vmem:[%s3885_s15 + $0x38] ss:$28 sps:$4 sm:$0xff]   ;;  %v2275_v45 = vld [vmem:[%s3884_s14] ss:$0 sm:$0xff] }
 0x129   :  { %v2462_v15 = vpop.f32.mrb[15].mxu0 }
 0x12a   :  { %v676_v16 = vadd.f32 %v2460_v13, %v628_v59  ;;  %v2781_v59 = vpack.c.bf16 %v1059_v58, %v1058_v57  ;;  %v1268_v58 = vld [vmem:[%s3883_s13 + $0x30] sm:$0xff] }
 0x12c   :  { %v724_v17 = vadd.f32 %v2551_v60, %v676_v16  ;;  %v1060_v60 = vld [vmem:[%s3879_s9 + $0x40] sm:$0xff] }
 0x12d   :  { %v2784_v62 = vpack.c.bf16 %v1061_v61, %v1060_v60  ;;  %v2885_v61 = vld [vmem:[%s3885_s15] ss:$28 sps:$4 sm:$0xff]  }
 0x12e   :  { %2969 = vtanh.f32 %v724_v17 }
 0x130   :  { %v2966_v18 = vpop.eup %2965 }
 0x131   :  { %2586 = vmatmul.mubr.f32.vlgmr.msra.gmra.mrb[12].mxu1 %v2966_v18 }
 0x132   :  { %2588 = vmatprep.mubr.msk.f32.mxu1 %vm3110_vm1, %v3111_v27  ;;  %v2968_v19 = vpop.eup %2967  ;;  %2773 = vmatpush3.bf16.msra.mxu1 %v2772_v51 }
 0x133   :  { %2774 = vmatprep.subr.bf16.mxu1 %v3109_v4 }
 0x135   :  { %2589 = vmatmul.mubr.f32.gmra.mrb[14].mxu1 %v2968_v19  ;;  %v1066_v19 = vld [vmem:[%s3879_s9 + $0x70] sm:$0xff] }
 0x136   :  { %2591 = vmatprep.mubr.msk.f32.mxu1 %vm3110_vm1, %v3111_v27  ;;  %2776 = vmatpush3.bf16.msra.mxu1 %v2775_v53  ;;  %v1265_v53 = vld [vmem:[%s3883_s13 + $0x18] sm:$0xff] }
 0x137   :  { %2777 = vmatprep.subr.bf16.mxu1 %v3109_v4  ;;  %v2803_v54 = vpack.c.bf16 %v1265_v53, %v1264_v52 }
 0x138   :  { %v2970_v20 = vpop.eup %2969 }
 0x139   :  { %2592 = vmatmul.mubr.f32.gmra.mrb[16].mxu1 %v2970_v20  ;;  %v1067_v20 = vld [vmem:[%s3879_s9 + $0x78] sm:$0xff] }
 0x13a   :  { %2664 = vmatprep.mubr.msk.f32.mxu1 %vm3110_vm1, %v3111_v27  ;;  %2779 = vmatpush3.bf16.msra.mxu1 %v2778_v56  ;;  %v2793_v21 = vpack.c.bf16 %v1067_v20, %v1066_v19  ;;  %v1267_v56 = vld [vmem:[%s3883_s13 + $0x28] sm:$0xff]  ;;  %v2894_v19 = vld [vmem:[%s3885_s15 + $0x40] ss:$28 sps:$4 sm:$0xff]  }
 0x13b   :  { %2780 = vmatprep.subr.bf16.mxu1 %v3109_v4  ;;  %v2806_v57 = vpack.c.bf16 %v1267_v56, %v1266_v55  ;;  %v2902_v20 = vld [vmem:[%s3885_s15 + $0x7c] ss:$28 sps:$4 sm:$0xff]  }
 0x13e   :  { %2782 = vmatpush3.bf16.msra.mxu1 %v2781_v59  ;;  %v1269_v59 = vld [vmem:[%s3883_s13 + $0x38] sm:$0xff] }
 0x13f   :  { %2783 = vmatprep.subr.bf16.mxu1 %v3109_v4  ;;  %v2809_v60 = vpack.c.bf16 %v1269_v59, %v1268_v58  ;;  %v2939_v59 = vld [vmem:[%s3885_s15 + $0x4c] ss:$28 sps:$4 sm:$0xff]  }
 0x142   :  { %2785 = vmatpush3.bf16.msra.mxu1 %v2784_v62  ;;  %v2887_v62 = vld [vmem:[%s3885_s15 + $0x4] ss:$28 sps:$4 sm:$0xff]  }
 0x143   :  { %2786 = vmatprep.subr.bf16.mxu1 %v3109_v4 }
 0x146   :  { %2788 = vmatpush3.bf16.msra.mxu1 %v2787_v1  ;;  %v2899_v1 = vld [vmem:[%s3885_s15 + $0x74] ss:$28 sps:$4 sm:$0xff]  }
 0x147   :  { %2789 = vmatprep.subr.bf16.mxu1 %v3109_v4 }
 0x14a   :  { %2791 = vmatpush3.bf16.msra.mxu1 %v2790_v5  ;;  %v2903_v5 = vld [vmem:[%s3885_s15 + $0xa8] ss:$28 sps:$4 sm:$0xff]  }
 0x14b   :  { %2792 = vmatprep.subr.bf16.mxu1 %v3109_v4 }
 0x14e   :  { %2794 = vmatpush3.bf16.msra.mxu1 %v2793_v21 }
 0x14f   :  { %1760 = vmatprep.subr.bf16.mxu1 %v2887_v62  ;;  %v2943_v62 = vld [vmem:[%s3885_s15 + $0x84] ss:$28 sps:$4 sm:$0xff]  }
 0x204   :  { %v821_v32 = vpop.f32.mrb[12].mxu1 }
 0x205   :  { %v822_v33 = vadd.f32 %v2259_v31, %v821_v32  ;;  %v2587_v34 = vpop.f32.mrb[13].mxu1 }
 0x206   :  { %v1159_v34 = vld [vmem:[%s3881_s11 + $0x8] sm:$0xf] }
 0x207   :  { %2971 = vtanh.f32 %v822_v33  ;;  %v1158_v33 = vld [vmem:[%s3881_s11] sm:$0xff] }
 0x208   :  { %v826_v35 = vpop.f32.mrb[14].mxu1 }
 0x209   :  { %v827_v36 = vadd.f32 %v2259_v31, %v826_v35  ;;  %v2590_v37 = vpop.f32.mrb[15].mxu1  ;;  %v2796_v35 = vpack.c.bf16 %v1159_v34, %v1158_v33  ;;  %v2918_v33 = vld [vmem:[%s3885_s15 + $0x120] ss:$28 sps:$4 sm:$0xff]   ;;  %v2923_v34 = vld [vmem:[%s3885_s15 + $0x154] ss:$28 sps:$4 sm:$0xff]  }
 0x20b   :  { %2973 = vtanh.f32 %v827_v36  ;;  %v2269_v36 = vld [vmem:[%s3880_s10] ss:$0 sm:$0xff] }
 0x20c   :  { %v831_v38 = vpop.f32.mrb[16].mxu1 }
 0x20d   :  { %v832_v39 = vadd.f32 %v2259_v31, %v831_v38  ;;  %v2593_v40 = vpop.f32.mrb[17].mxu1 }
 0x20f   :  { %2975 = vtanh.f32 %v832_v39 }
 0x211   :  { %v2972_v41 = vpop.eup %2971 }
 0x212   :  { %2611 = vmatmul.mubr.msk.f32.vlgmr.msra.gmra.mrb[16].mxu0 %vm853_vm2, %v2972_v41 }
 0x213   :  { %2613 = vmatprep.mubr.msk.f32.mxu0 %vm3110_vm1, %v3111_v27  ;;  %2770 = vmatpush3.bf16.msk.msra.mxu0 %vm3509_vm5, %v2768_v46 }
 0x214   :  { %2795 = vmatprep.subr.bf16.mxu0 %v3109_v4 }
 0x215   :  { %v2974_v42 = vpop.eup %2973 }
 0x216   :  { %2614 = vmatmul.mubr.msk.f32.gmra.mrb[18].mxu0 %vm853_vm2, %v2974_v42 }
 0x217   :  { %2616 = vmatprep.mubr.msk.f32.mxu0 %vm3110_vm1, %v3111_v27 }
 0x219   :  { %v2976_v43 = vpop.eup %2975 }
 0x21a   :  { %2617 = vmatmul.mubr.msk.f32.gmra.mrb[20].mxu0 %vm853_vm2, %v2976_v43 }
 0x21b   :  { %2623 = vmatprep.mubr.msk.f32.mxu0 %vm3110_vm1, %v3111_v27 }
 0x2e5   :  { %v929_v7 = vpop.f32.mrb[16].mxu0 }
 0x2e6   :  { %v930_v8 = vadd.f32 %v2260_v6, %v929_v7  ;;  %v2612_v9 = vpop.f32.mrb[17].mxu0 }
 0x2e8   :  { %2977 = vtanh.f32 %v930_v8 }
 0x2e9   :  { %v934_v10 = vpop.f32.mrb[18].mxu0 }
 0x2ea   :  { %v935_v11 = vadd.f32 %v2260_v6, %v934_v10  ;;  %v2615_v12 = vpop.f32.mrb[19].mxu0 }
 0x2ec   :  { %2979 = vtanh.f32 %v935_v11 }
 0x2ed   :  { %v939_v13 = vpop.f32.mrb[20].mxu0 }
 0x2ee   :  { %v940_v14 = vadd.f32 %v2260_v6, %v939_v13  ;;  %v2618_v15 = vpop.f32.mrb[21].mxu0  ;;  %v2270_v6 = vld [vmem:[%s3882_s12] ss:$0 sm:$0xff] }
 0x2f0   :  { %2981 = vtanh.f32 %v940_v14 }
 0x2f2   :  { %v2978_v16 = vpop.eup %2977 }
 0x2f3   :  { %2624 = vmatmul.mubr.msk.f32.vlgmr.msra.gmra.mrb[22].mxu0 %vm955_vm6, %v2978_v16  ;;  %v2888_v16 = vld [vmem:[%s3885_s15 + $0x8] ss:$28 sps:$4 sm:$0xff]  }
 0x2f4   :  { %2626 = vmatprep.mubr.msk.f32.mxu0 %vm3110_vm1, %v3111_v27  ;;  %2798 = vmatpush3.bf16.msk.msra.mxu0 %vm3509_vm5, %v2796_v35  ;;  %v2926_v35 = vld [vmem:[%s3885_s15 + $0x15c] ss:$28 sps:$4 sm:$0xff]  }
 0x2f5   :  { %2799 = vmatprep.subr.bf16.mxu0 %v3109_v4 }
 0x2f6   :  { %v2980_v17 = vpop.eup %2979 }
 0x2f7   :  { %2627 = vmatmul.mubr.msk.f32.gmra.mrb[24].mxu0 %vm955_vm6, %v2980_v17  ;;  %v2896_v17 = vld [vmem:[%s3885_s15 + $0x44] ss:$28 sps:$4 sm:$0xff]  }
 0x2f8   :  { %2629 = vmatprep.mubr.msk.f32.mxu0 %vm3110_vm1, %v3111_v27 }
 0x2fa   :  { %v2982_v18 = vpop.eup %2981 }
 0x2fb   :  { %2630 = vmatmul.mubr.msk.f32.gmra.mrb[26].mxu0 %vm955_vm6, %v2982_v18 }
 0x2fc   :  { %2677 = vmatprep.mubr.msk.f32.mxu0 %vm3110_vm1, %v3111_v27 }
 0x3c6   :  { %v1035_v23 = vpop.f32.mrb[22].mxu0 }
 0x3c7   :  { %v1036_v24 = vadd.f32 %v2264_v22, %v1035_v23  ;;  %v2625_v25 = vpop.f32.mrb[23].mxu0  ;;  %v2908_v23 = vld [vmem:[%s3885_s15 + $0xb4] ss:$28 sps:$4 sm:$0xff]  }
 0x3c8   :  { %v2906_v25 = vld [vmem:[%s3885_s15 + $0xb0] ss:$28 sps:$4 sm:$0xff]  }
 0x3c9   :  { %1049 = vst [vmem:[%s3887_s17] sm:$0xff] %v1036_v24  ;;  %2665 = vmatmul.mubr.f32.vlgmr.msra.gmra.mrb[18].mxu1 %v1036_v24 }
 0x3ca   :  { %v1040_v26 = vpop.f32.mrb[24].mxu0  ;;  %2667 = vmatprep.mubr.msk.f32.mxu1 %vm3110_vm1, %v3111_v27  ;;  %1761 = vmatpush1.bf16.msra.mxu1 %v2885_v61  ;;  %v2937_v61 = vld [vmem:[%s3885_s15 + $0x48] ss:$28 sps:$4 sm:$0xff]  }
 0x3cb   :  { %v1041_v28 = vadd.f32 %v2264_v22, %v1040_v26  ;;  %v2628_v29 = vpop.f32.mrb[25].mxu0  ;;  %1762 = vmatprep.subr.bf16.mxu1 %v2893_v63  ;;  %v2914_v26 = vld [vmem:[%s3885_s15 + $0xec] ss:$28 sps:$4 sm:$0xff]  }
 0x3cc   :  { %v2912_v29 = vld [vmem:[%s3885_s15 + $0xe8] ss:$28 sps:$4 sm:$0xff]  }
 0x3cd   :  { %1050 = vst [vmem:[%s3887_s17 + $0x8] sm:$0xff] %v1041_v28  ;;  %2668 = vmatmul.mubr.f32.gmra.mrb[20].mxu1 %v1041_v28  ;;  %v2909_v28 = vld [vmem:[%s3885_s15 + $0xe0] ss:$28 sps:$4 sm:$0xff]  }
 0x3ce   :  { %v1045_v30 = vpop.f32.mrb[26].mxu0  ;;  %2670 = vmatprep.mubr.msk.f32.mxu1 %vm3110_vm1, %v3111_v27  ;;  %1763 = vmatpush1.bf16.msra.mxu1 %v2891_v0  ;;  %v2941_v0 = vld [vmem:[%s3885_s15 + $0x80] ss:$28 sps:$4 sm:$0xff]  }
 0x3cf   :  { %v1046_v31 = vadd.f32 %v2264_v22, %v1045_v30  ;;  %v2631_v32 = vpop.f32.mrb[27].mxu0  ;;  %1764 = vmatprep.subr.bf16.mxu1 %v2899_v1  ;;  %v2900_v22 = vld [vmem:[%s3885_s15 + $0x78] ss:$28 sps:$4 sm:$0xff]  }
 0x3d0   :  { %v2917_v30 = vld [vmem:[%s3885_s15 + $0x11c] ss:$28 sps:$4 sm:$0xff]  }
 0x3d1   :  { %1051 = vst [vmem:[%s3887_s17 + $0x10] sm:$0xff] %v1046_v31  ;;  %2671 = vmatmul.mubr.f32.gmra.mrb[22].mxu1 %v1046_v31  ;;  %v2920_v31 = vld [vmem:[%s3885_s15 + $0x124] ss:$28 sps:$4 sm:$0xff]   ;;  %v2915_v32 = vld [vmem:[%s3885_s15 + $0x118] ss:$28 sps:$4 sm:$0xff]  }
 0x3d2   :  { %1765 = vmatpush1.bf16.msra.mxu1 %v2897_v2  ;;  %1792 = vmatprep.mubr.bf16.mxu1 %v3113_v44  ;;  %v2947_v2 = vld [vmem:[%s3885_s15 + $0xbc] ss:$28 sps:$4 sm:$0xff]  }
 0x3d3   :  { %1766 = vmatprep.subr.bf16.mxu1 %v2905_v3  ;;  %v2948_v3 = vld [vmem:[%s3885_s15 + $0xc0] ss:$28 sps:$4 sm:$0xff]  }
 0x3d6   :  { %1767 = vmatpush1.bf16.msra.mxu1 %v2903_v5  ;;  %v2945_v5 = vld [vmem:[%s3885_s15 + $0xb8] ss:$28 sps:$4 sm:$0xff]  }
 0x49c   :  { %v1141_v37 = vpop.f32.mrb[18].mxu1 }
 0x49d   :  { %v1142_v38 = vadd.f32 %v2269_v36, %v1141_v37  ;;  %v2666_v39 = vpop.f32.mrb[19].mxu1  ;;  %v2924_v37 = vld [vmem:[%s3885_s15 + $0x158] ss:$28 sps:$4 sm:$0xff]  }
 0x49e   :  { %v2932_v39 = vld [vmem:[%s3885_s15 + $0x194] ss:$28 sps:$4 sm:$0xff]  }
 0x49f   :  { %2983 = vtanh.f32 %v1142_v38  ;;  %v2929_v38 = vld [vmem:[%s3885_s15 + $0x18c] ss:$28 sps:$4 sm:$0xff]  }
 0x4a0   :  { %v1146_v40 = vpop.f32.mrb[20].mxu1 }
 0x4a1   :  { %v1147_v41 = vadd.f32 %v2269_v36, %v1146_v40  ;;  %v2669_v42 = vpop.f32.mrb[21].mxu1  ;;  %v2927_v40 = vld [vmem:[%s3885_s15 + $0x188] ss:$28 sps:$4 sm:$0xff]  }
 0x4a2   :  { %v2935_v42 = vld [vmem:[%s3885_s15 + $0x14] ss:$28 sps:$4 sm:$0xff]  }
 0x4a3   :  { %2985 = vtanh.f32 %v1147_v41  ;;  %v2930_v41 = vld [vmem:[%s3885_s15 + $0x190] ss:$28 sps:$4 sm:$0xff]  }
 0x4a4   :  { %v1151_v43 = vpop.f32.mrb[22].mxu1 }
 0x4a5   :  { %v1152_v46 = vadd.f32 %v2269_v36, %v1151_v43  ;;  %v2672_v47 = vpop.f32.mrb[23].mxu1  ;;  %v2921_v36 = vld [vmem:[%s3885_s15 + $0x150] ss:$28 sps:$4 sm:$0xff]   ;;  %v2936_v43 = vld [vmem:[%s3885_s15 + $0x18] ss:$28 sps:$4 sm:$0xff]  }
 0x4a7   :  { %2987 = vtanh.f32 %v1152_v46 }
 0x4a9   :  { %v2984_v49 = vpop.eup %2983 }
 0x4aa   :  { %2678 = vmatmul.mubr.msk.f32.vlgmr.msra.gmra.mrb[28].mxu0 %vm955_vm6, %v2984_v49 }
 0x4ab   :  { %2680 = vmatprep.mubr.msk.f32.mxu0 %vm3110_vm1, %v3111_v27  ;;  %2801 = vmatpush3.bf16.msra.mxu0 %v2800_v48 }
 0x4ac   :  { %2802 = vmatprep.subr.bf16.mxu0 %v3109_v4 }
 0x4ad   :  { %v2986_v50 = vpop.eup %2985 }
 0x4ae   :  { %2681 = vmatmul.mubr.msk.f32.gmra.mrb[30].mxu0 %vm955_vm6, %v2986_v50 }
 0x4af   :  { %2683 = vmatprep.mubr.msk.f32.mxu0 %vm3110_vm1, %v3111_v27  ;;  %2804 = vmatpush3.bf16.msra.mxu0 %v2803_v54 }
 0x4b0   :  { %2805 = vmatprep.subr.bf16.mxu0 %v3109_v4 }
 0x4b1   :  { %v2988_v51 = vpop.eup %2987 }
 0x4b2   :  { %2684 = vmatmul.mubr.msk.f32.gmra.mrb[32].mxu0 %vm955_vm6, %v2988_v51 }
 0x4b3   :  { %2702 = vmatprep.mubr.msk.f32.mxu0 %vm3110_vm1, %v3111_v27  ;;  %2807 = vmatpush3.bf16.msra.mxu0 %v2806_v57  ;;  %v2933_v57 = vld [vmem:[%s3885_s15 + $0x10] ss:$28 sps:$4 sm:$0xff]  }
 0x4b4   :  { %2808 = vmatprep.subr.bf16.mxu0 %v3109_v4  ;;  %v2890_v4 = vld [vmem:[%s3885_s15 + $0xc] ss:$28 sps:$4 sm:$0xff]  }
 0x4b7   :  { %2810 = vmatpush3.bf16.msra.mxu0 %v2809_v60  ;;  %v2940_v60 = vld [vmem:[%s3885_s15 + $0x50] ss:$28 sps:$4 sm:$0xff]  }
 0x4b8   :  { %1811 = vmatprep.subr.bf16.mxu0 %v2890_v4  ;;  %v2944_v4 = vld [vmem:[%s3885_s15 + $0x88] ss:$28 sps:$4 sm:$0xff]  }
 0x57d   :  { %v1245_v7 = vpop.f32.mrb[28].mxu0 }
 0x57e   :  { %v1246_v8 = vadd.f32 %v2270_v6, %v1245_v7  ;;  %v2679_v9 = vpop.f32.mrb[29].mxu0  ;;  %v2952_v7 = vld [vmem:[%s3885_s15 + $0xf8] ss:$28 sps:$4 sm:$0xff]  }
 0x57f   :  { %v2955_v9 = vld [vmem:[%s3885_s15 + $0x12c] ss:$28 sps:$4 sm:$0xff]  }
 0x580   :  { %2989 = vtanh.f32 %v1246_v8  ;;  %v2949_v8 = vld [vmem:[%s3885_s15 + $0xf0] ss:$28 sps:$4 sm:$0xff]  }
 0x581   :  { %v1250_v10 = vpop.f32.mrb[30].mxu0 }
 0x582   :  { %v1251_v11 = vadd.f32 %v2270_v6, %v1250_v10  ;;  %v2682_v12 = vpop.f32.mrb[31].mxu0  ;;  %v2956_v10 = vld [vmem:[%s3885_s15 + $0x130] ss:$28 sps:$4 sm:$0xff]  }
 0x583   :  { %v2959_v12 = vld [vmem:[%s3885_s15 + $0x164] ss:$28 sps:$4 sm:$0xff]  }
 0x584   :  { %2991 = vtanh.f32 %v1251_v11  ;;  %v2953_v11 = vld [vmem:[%s3885_s15 + $0x128] ss:$28 sps:$4 sm:$0xff]  }
 0x585   :  { %v1255_v13 = vpop.f32.mrb[32].mxu0 }
 0x586   :  { %v1256_v14 = vadd.f32 %v2270_v6, %v1255_v13  ;;  %v2685_v15 = vpop.f32.mrb[33].mxu0  ;;  %v2951_v6 = vld [vmem:[%s3885_s15 + $0xf4] ss:$28 sps:$4 sm:$0xff]   ;;  %v2960_v13 = vld [vmem:[%s3885_s15 + $0x168] ss:$28 sps:$4 sm:$0xff]  }
 0x587   :  { %v2963_v15 = vld [vmem:[%s3885_s15 + $0x19c] ss:$28 sps:$4 sm:$0xff]  }
 0x588   :  { %2993 = vtanh.f32 %v1256_v14  ;;  %v2957_v14 = vld [vmem:[%s3885_s15 + $0x160] ss:$28 sps:$4 sm:$0xff]  }
 0x58a   :  { %v2990_v18 = vpop.eup %2989 }
 0x58b   :  { %2703 = vmatmul.mubr.msk.f32.vlgmr.msra.gmra.mrb[34].mxu0 %vm853_vm2, %v2990_v18  ;;  %v1437_v18 = vlaneseq }
 0x58c   :  { %2705 = vmatprep.mubr.msk.f32.mxu0 %vm3110_vm1, %v3111_v27  ;;  %1812 = vmatpush1.bf16.msra.mxu0 %v2888_v16  ;;  %v2964_v16 = vld [vmem:[%s3885_s15 + $0x1a0] ss:$28 sps:$4 sm:$0xff]  }
 0x58d   :  { %1813 = vmatprep.subr.bf16.mxu0 %v2896_v17  ;;  %v2961_v17 = vld [vmem:[%s3885_s15 + $0x198] ss:$28 sps:$4 sm:$0xff]  }
 0x58e   :  { %v2992_v21 = vpop.eup %2991 }
 0x58f   :  { %2706 = vmatmul.mubr.msk.f32.gmra.mrb[36].mxu0 %vm853_vm2, %v2992_v21 }
 0x590   :  { %2708 = vmatprep.mubr.msk.f32.mxu0 %vm3110_vm1, %v3111_v27  ;;  %1814 = vmatpush1.bf16.msra.mxu0 %v2894_v19  ;;  %v2911_v27 = vld [vmem:[%s3885_s15 + $0xe4] ss:$28 sps:$4 sm:$0xff]   ;;  %v3834_v19 = vshrl.u32 %v1437_v18, 7  ;;  %s3114_s15 = smov [#allocation2]  }
 0x591   :  { %1815 = vmatprep.subr.bf16.mxu0 %v2902_v20  ;;  %1768 = vmatprep.subr.bf16.mxu1 %v2911_v27 }
 0x592   :  { %v2994_v24 = vpop.eup %2993  ;;  %1769 = vmatpush1.bf16.msra.mxu1 %v2909_v28  ;;  %v1439_v20 = vsub.s32 0, %v3834_v19  ;;  %v1447_v21 = vsub.s32 2, %v3834_v19 }
 0x593   :  { %2709 = vmatmul.mubr.msk.f32.gmra.mrb[38].mxu0 %vm853_vm2, %v2994_v24  ;;  %1770 = vmatprep.subr.bf16.mxu1 %v2917_v30  ;;  %v1451_v24 = vsub.s32 3, %v3834_v19 }
 0x594   :  { %1816 = vmatpush1.bf16.msra.mxu0 %v2900_v22  ;;  %1843 = vmatprep.mubr.bf16.mxu0 %v3113_v44  ;;  %v3841_v22 = vld [vmem:[%s3886_s16] sm:$0x7f]  ;;  %s2180_s16 = sshll.u32 %s3114_s15, 4  ;;  %s2181_s16 = int_to_ptr.vmem [resolvable:$true] %s2180_s16 }
 0x595   :  { %1817 = vmatprep.subr.bf16.mxu0 %v2908_v23  ;;  %v1443_v23 = vsub.s32 1, %v3834_v19  ;;  %v1448_v27 = vrot.slane %v3841_v22, %v1447_v21  ;;  %v1452_v28 = vrot.slane %v3841_v22, %v1451_v24  ;;  %s3085_s13 = scalar_lea.vmem %s2181_s16, 1344  ;;  %p3090_p1 = scmp.lt.s32.totalorder %s2181_s16, %s2181_s16 }
 0x596   :  { %1771 = vmatpush1.bf16.msra.mxu1 %v2915_v32  ;;  %p3086_p0 = scmp.ne.s32.totalorder %s2181_s16, %s3085_s13  ;;  %p3091_p2 = scmp.lt.s32.totalorder %s3085_s13, %s3085_s13 }
 0x597   :  { %1772 = vmatprep.subr.bf16.mxu1 %v2923_v34 }
 0x598   :  { %1818 = vmatpush1.bf16.msra.mxu0 %v2906_v25  ;;  %v1440_v25 = vrot.slane %v3841_v22, %v1439_v20  ;;  %p3092_p3 = por %p3091_p2, %p3090_p1 }
 0x599   :  { %1819 = vmatprep.subr.bf16.mxu0 %v2914_v26  ;;  %v1444_v26 = vrot.slane %v3841_v22, %v1443_v23 }
 0x59a   :  { %1773 = vmatpush1.bf16.msra.mxu1 %v2921_v36  ;;  %p3093_p4 = pnand %p3092_p3, %p3086_p0 }
 0x59b   :  { %1774 = vmatprep.subr.bf16.mxu1 %v2929_v38 }
 0x59c   :  { %1820 = vmatpush1.bf16.msra.mxu0 %v2912_v29 }
 0x59d   :  { %1821 = vmatprep.subr.bf16.mxu0 %v2920_v31 }
 0x59e   :  { %1775 = vmatpush1.bf16.msra.mxu1 %v2927_v40 }
 0x59f   :  { %1862 = vmatprep.subr.bf16.mxu1 %v2935_v42 }
 0x5a0   :  { %1822 = vmatpush1.bf16.msra.mxu0 %v2918_v33 }
 0x5a1   :  { %1823 = vmatprep.subr.bf16.mxu0 %v2926_v35 }
 0x5a4   :  { %1824 = vmatpush1.bf16.msra.mxu0 %v2924_v37 }
 0x5a5   :  { %1825 = vmatprep.subr.bf16.mxu0 %v2932_v39 }
 0x5a8   :  { %1826 = vmatpush1.bf16.msra.mxu0 %v2930_v41 }
 0x5a9   :  { %2711 = vmatprep.subr.bf16.mxu0 %v2936_v43 }
 0x65e   :  { %v1352_v46 = vpop.f32.mrb[34].mxu0 }
 0x65f   :  { %v2704_v47 = vpop.f32.mrb[35].mxu0  ;;  %v1353_v48 = vadd.f32 %v2275_v45, %v1352_v46 }
 0x661   :  { %2995 = vtanh.f32 %v1353_v48 }
 0x662   :  { %v1357_v49 = vpop.f32.mrb[36].mxu0 }
 0x663   :  { %v1358_v50 = vadd.f32 %v2275_v45, %v1357_v49  ;;  %v2707_v51 = vpop.f32.mrb[37].mxu0 }
 0x665   :  { %2997 = vtanh.f32 %v1358_v50 }
 0x666   :  { %v1362_v52 = vpop.f32.mrb[38].mxu0 }
 0x667   :  { %v1363_v53 = vadd.f32 %v2275_v45, %v1362_v52  ;;  %v2710_v54 = vpop.f32.mrb[39].mxu0 }
 0x669   :  { %2999 = vtanh.f32 %v1363_v53 }
 0x66b   :  { %v2996_v55 = vpop.eup %2995 }
 0x66f   :  { %v2998_v56 = vpop.eup %2997 }
 0x670   :  { %v1369_v58 = vpack.c.bf16 %v2998_v56, %v2996_v55 }
 0x672   :  { %1793 = vmatmul.mubr.bf16.vlgmr.msra.gmra.mrb[24].mxu1 %v1369_v58  ;;  %1844 = vmatmul.mubr.bf16.vlgmr.msra.gmra.mrb[40].mxu0 %v1369_v58 }
 0x673   :  { %1863 = vmatpush1.bf16.msra.mxu1 %v2933_v57  ;;  %2712 = vmatpush3.bf16.msra.mxu0 %v2936_v43  ;;  %v3000_v63 = vpop.eup %2999 }
 0x674   :  { %1864 = vmatprep.subr.bf16.mxu1 %v2939_v59  ;;  %2713 = vmatprep.subr.bf16.mxu0 %v2940_v60  ;;  %v1370_v1 = vpack.c.bf16 %v3000_v63, %v3000_v63 }
 0x675   :  { %1802 = vmatprep.mubr.bf16.mxu1 %v3113_v44  ;;  %1853 = vmatprep.mubr.bf16.mxu0 %v3113_v44 }
 0x677   :  { %1865 = vmatpush1.bf16.msra.mxu1 %v2937_v61  ;;  %2714 = vmatpush3.bf16.msra.mxu0 %v2940_v60 }
 0x678   :  { %1866 = vmatprep.subr.bf16.mxu1 %v2943_v62  ;;  %2715 = vmatprep.subr.bf16.mxu0 %v2944_v4 }
 0x67a   :  { %1803 = vmatmul.mubr.bf16.gmra.mrb[28].mxu1 %v1370_v1  ;;  %1854 = vmatmul.mubr.bf16.gmra.mrb[44].mxu0 %v1370_v1 }
 0x67b   :  { %1867 = vmatpush1.bf16.msra.mxu1 %v2941_v0  ;;  %2716 = vmatpush3.bf16.msra.mxu0 %v2944_v4 }
 0x67c   :  { %2727 = vmatprep.mubr.bf16.mxu0 %v1369_v58  ;;  %1868 = vmatprep.subr.bf16.mxu1 %v2947_v2 }
 0x67d   :  { %2717 = vmatprep.subr.bf16.mxu0 %v2948_v3  ;;  %1894 = vmatprep.mubr.bf16.mxu1 %v3113_v44 }
 0x67f   :  { %1869 = vmatpush1.bf16.msra.mxu1 %v2945_v5  ;;  %2718 = vmatpush3.bf16.msra.mxu0 %v2948_v3 }
 0x680   :  { %1870 = vmatprep.subr.bf16.mxu1 %v2951_v6  ;;  %2719 = vmatprep.subr.bf16.mxu0 %v2952_v7 }
 0x683   :  { %1871 = vmatpush1.bf16.msra.mxu1 %v2949_v8  ;;  %2720 = vmatpush3.bf16.msra.mxu0 %v2952_v7 }
 0x684   :  { %1872 = vmatprep.subr.bf16.mxu1 %v2955_v9  ;;  %2721 = vmatprep.subr.bf16.mxu0 %v2956_v10 }
 0x687   :  { %1873 = vmatpush1.bf16.msra.mxu1 %v2953_v11  ;;  %2722 = vmatpush3.bf16.msra.mxu0 %v2956_v10 }
 0x688   :  { %1874 = vmatprep.subr.bf16.mxu1 %v2959_v12  ;;  %2723 = vmatprep.subr.bf16.mxu0 %v2960_v13 }
 0x68b   :  { %1875 = vmatpush1.bf16.msra.mxu1 %v2957_v14  ;;  %2724 = vmatpush3.bf16.msra.mxu0 %v2960_v13 }
 0x68c   :  { %1876 = vmatprep.subr.bf16.mxu1 %v2963_v15  ;;  %2725 = vmatprep.subr.bf16.mxu0 %v2964_v16 }
 0x68f   :  { %1877 = vmatpush1.bf16.msra.mxu1 %v2961_v17  ;;  %2726 = vmatpush3.bf16.msra.mxu0 %v2964_v16 }
 0x692   :  { %1895 = vmatmul.mubr.bf16.vlgmr.msra.gmra.mrb[32].mxu1 %v1369_v58  ;;  %2728 = vmatmul.mubr.bf16.vlgmr.msra.gmra.mrb[48].mxu0 %v1370_v1 }
 0x693   :  { %1904 = vmatprep.mubr.bf16.mxu1 %v3113_v44 }
 0x69a   :  { %1905 = vmatmul.mubr.bf16.gmra.mrb[36].mxu1 %v1370_v1 }
 0x745   :  { %v1794_v29 = vpop.f32.mrb[24].mxu1  ;;  %v1845_v30 = vpop.f32.mrb[40].mxu0 }
 0x746   :  { %v1795_v31 = vadd.f32 %v1794_v29, %v1440_v25  ;;  %v1846_v32 = vadd.f32 %v1845_v30, %v1448_v27  ;;  %v1796_v33 = vpop.f32.mrb[25].mxu1  ;;  %v1847_v34 = vpop.f32.mrb[41].mxu0  ;;  %v1463_v29 = vsub.s32 6, %v3834_v19 }
 0x747   :  { %v1797_v35 = vadd.f32 %v1796_v33, %v1444_v26  ;;  %v1848_v36 = vadd.f32 %v1847_v34, %v1452_v28  ;;  %v1798_v37 = vpop.f32.mrb[26].mxu1  ;;  %v1849_v38 = vpop.f32.mrb[42].mxu0 }
 0x748   :  { %v2335_v39 = vmul.f32 -1.442695, %v1795_v31  ;;  %v2337_v40 = vmul.f32 -1.442695, %v1846_v32  ;;  %v1799_v41 = vadd.f32 %v1798_v37, %v1440_v25  ;;  %v1850_v42 = vadd.f32 %v1849_v38, %v1448_v27  ;;  %v1800_v43 = vpop.f32.mrb[27].mxu1  ;;  %v1851_v44 = vpop.f32.mrb[43].mxu0 }
 0x749   :  { %v2336_v45 = vmul.f32 -1.442695, %v1797_v35  ;;  %v2338_v46 = vmul.f32 -1.442695, %v1848_v36  ;;  %v1801_v47 = vadd.f32 %v1800_v43, %v1444_v26  ;;  %v1852_v48 = vadd.f32 %v1851_v44, %v1452_v28 }
 0x74a   :  { %3001 = vpow2.f32 %v2335_v39  ;;  %v2342_v49 = vmul.f32 -1.442695, %v1799_v41  ;;  %v2344_v50 = vmul.f32 -1.442695, %v1850_v42  ;;  %v1459_v32 = vsub.s32 5, %v3834_v19 }
 0x74b   :  { %3003 = vpow2.f32 %v2337_v40  ;;  %v2343_v51 = vmul.f32 -1.442695, %v1801_v47  ;;  %v2345_v52 = vmul.f32 -1.442695, %v1852_v48  ;;  %v1464_v37 = vrot.slane %v3841_v22, %v1463_v29 }
 0x74c   :  { %3005 = vpow2.f32 %v2336_v45  ;;  %v1460_v39 = vrot.slane %v3841_v22, %v1459_v32 }
 0x74d   :  { %3007 = vpow2.f32 %v2338_v46  ;;  %v1804_v53 = vpop.f32.mrb[28].mxu1  ;;  %v1855_v54 = vpop.f32.mrb[44].mxu0 }
 0x74e   :  { %3009 = vpow2.f32 %v2342_v49  ;;  %v1805_v55 = vadd.f32 %v1804_v53, %v1440_v25  ;;  %v1856_v56 = vadd.f32 %v1855_v54, %v1448_v27  ;;  %v1806_v57 = vpop.f32.mrb[29].mxu1  ;;  %v1857_v58 = vpop.f32.mrb[45].mxu0 }
 0x74f   :  { %3011 = vpow2.f32 %v2344_v50  ;;  %v1807_v59 = vadd.f32 %v1806_v57, %v1444_v26  ;;  %v1858_v60 = vadd.f32 %v1857_v58, %v1452_v28  ;;  %v1808_v61 = vpop.f32.mrb[30].mxu1  ;;  %v1859_v62 = vpop.f32.mrb[46].mxu0  ;;  %v1455_v28 = vsub.s32 4, %v3834_v19 }
 0x750   :  { %3013 = vpow2.f32 %v2343_v51  ;;  %v2349_v4 = vmul.f32 -1.442695, %v1805_v55  ;;  %v2351_v63 = vmul.f32 -1.442695, %v1856_v56  ;;  %v1809_v0 = vpop.f32.mrb[31].mxu1  ;;  %v1860_v1 = vpop.f32.mrb[47].mxu0 }
 0x751   :  { %3015 = vpow2.f32 %v2345_v52  ;;  %v2350_v2 = vmul.f32 -1.442695, %v1807_v59  ;;  %v2352_v3 = vmul.f32 -1.442695, %v1858_v60  ;;  %v1456_v36 = vrot.slane %v3841_v22, %v1455_v28 }
 0x752   :  { %3017 = vpow2.f32 %v2349_v4 }
 0x753   :  { %3019 = vpow2.f32 %v2351_v63 }
 0x754   :  { %v3002_v5 = vpop.eup %3001  ;;  %3021 = vpow2.f32 %v2350_v2 }
 0x755   :  { %v3004_v6 = vpop.eup %3003  ;;  %v2024_v7 = vadd.f32 1.0, %v3002_v5  ;;  %3023 = vpow2.f32 %v2352_v3 }
 0x756   :  { %v3006_v8 = vpop.eup %3005  ;;  %v2026_v9 = vadd.f32 1.0, %v3004_v6 }
 0x757   :  { %v3008_v10 = vpop.eup %3007  ;;  %3025 = vrcp.f32 %v2024_v7  ;;  %v2025_v11 = vadd.f32 1.0, %v3006_v8 }
 0x758   :  { %v3010_v12 = vpop.eup %3009  ;;  %3027 = vrcp.f32 %v2026_v9  ;;  %v2027_v13 = vadd.f32 1.0, %v3008_v10 }
 0x759   :  { %v3012_v14 = vpop.eup %3011  ;;  %3029 = vrcp.f32 %v2025_v11  ;;  %v2031_v15 = vadd.f32 1.0, %v3010_v12 }
 0x75a   :  { %v3014_v16 = vpop.eup %3013  ;;  %3031 = vrcp.f32 %v2027_v13  ;;  %v2033_v17 = vadd.f32 1.0, %v3012_v14 }
 0x75b   :  { %v3016_v18 = vpop.eup %3015  ;;  %3033 = vrcp.f32 %v2031_v15  ;;  %v2032_v20 = vadd.f32 1.0, %v3014_v16 }
 0x75c   :  { %v3018_v21 = vpop.eup %3017  ;;  %3035 = vrcp.f32 %v2033_v17  ;;  %v2034_v23 = vadd.f32 1.0, %v3016_v18 }
 0x75d   :  { %v3020_v24 = vpop.eup %3019  ;;  %3037 = vrcp.f32 %v2032_v20  ;;  %v2038_v25 = vadd.f32 1.0, %v3018_v21 }
 0x75e   :  { %v3022_v27 = vpop.eup %3021  ;;  %3039 = vrcp.f32 %v2034_v23  ;;  %v2040_v26 = vadd.f32 1.0, %v3020_v24 }
 0x75f   :  { %v3024_v30 = vpop.eup %3023  ;;  %3041 = vrcp.f32 %v2038_v25  ;;  %v2039_v31 = vadd.f32 1.0, %v3022_v27 }
 0x760   :  { %3043 = vrcp.f32 %v2040_v26  ;;  %v2041_v33 = vadd.f32 1.0, %v3024_v30 }
 0x761   :  { %v3026_v34 = vpop.eup %3025  ;;  %3045 = vrcp.f32 %v2039_v31 }
 0x762   :  { %v3028_v35 = vpop.eup %3027  ;;  %3047 = vrcp.f32 %v2041_v33 }
 0x763   :  { %v3030_v38 = vpop.eup %3029 }
 0x764   :  { %v3032_v40 = vpop.eup %3031  ;;  %v2368_v41 = vpack.c.bf16 %v3030_v38, %v3026_v34 }
 0x765   :  { %v3034_v42 = vpop.eup %3033  ;;  %v2369_v43 = vpack.c.bf16 %v3032_v40, %v3028_v35  ;;  %v1896_v44 = vpop.f32.mrb[32].mxu1 }
 0x766   :  { %v2729_v45 = vpop.f32.mrb[48].mxu0  ;;  %v3036_v19 = vpop.eup %3035  ;;  %2160 = vst [vmem:[#allocation2] sm:$0xff] %v2368_v41  ;;  %v1897_v46 = vadd.f32 %v1896_v44, %v1456_v36 }
 0x767   :  { %v1956_v47 = vadd.f32 %v2729_v45, %v1464_v37  ;;  %v1898_v48 = vpop.f32.mrb[33].mxu1  ;;  %v1947_v49 = vpop.f32.mrb[49].mxu0  ;;  %2161 = vst [vmem:[#allocation2 + $0x8] sm:$0xff] %v2369_v43 }
 0x768   :  { %v3038_v50 = vpop.eup %3037  ;;  %v1899_v51 = vadd.f32 %v1898_v48, %v1460_v39  ;;  %v1948_v52 = vadd.f32 %v1947_v49, %v1464_v37  ;;  %v1900_v53 = vpop.f32.mrb[34].mxu1  ;;  %v2339_v56 = vmul.f32 -1.442695, %v1897_v46 }
 0x769   :  { %v2730_v54 = vpop.f32.mrb[50].mxu0  ;;  %v3040_v55 = vpop.eup %3039  ;;  %v2372_v22 = vpack.c.bf16 %v3038_v50, %v3034_v42  ;;  %v2355_v57 = vmul.f32 -1.442695, %v1956_v47  ;;  %v1901_v58 = vadd.f32 %v1900_v53, %v1456_v36 }
 0x76a   :  { %v1902_v59 = vpop.f32.mrb[35].mxu1  ;;  %v1950_v60 = vpop.f32.mrb[51].mxu0  ;;  %v2373_v62 = vpack.c.bf16 %v3040_v55, %v3036_v19  ;;  %v2340_v4 = vmul.f32 -1.442695, %v1899_v51  ;;  %v2341_v63 = vmul.f32 -1.442695, %v1948_v52  ;;  %3049 = vpow2.f32 %v2339_v56 }
 0x76b   :  { %v3042_v61 = vpop.eup %3041  ;;  %v1903_v0 = vadd.f32 %v1902_v59, %v1460_v39  ;;  %2165 = vst [vmem:[#allocation2 + $0x1c] sm:$0xff] %v2372_v22  ;;  %v2346_v2 = vmul.f32 -1.442695, %v1901_v58  ;;  %v1951_v3 = vadd.f32 %v1950_v60, %v1464_v37  ;;  %3051 = vpow2.f32 %v2355_v57 }
 0x76c   :  { %v3044_v1 = vpop.eup %3043  ;;  %2166 = vst [vmem:[#allocation2 + $0x24] sm:$0xff] %v2373_v62  ;;  %3053 = vpow2.f32 %v2340_v4 }
 0x76d   :  { %v3046_v5 = vpop.eup %3045  ;;  %v2347_v6 = vmul.f32 -1.442695, %v1903_v0  ;;  %v2348_v9 = vmul.f32 -1.442695, %v1951_v3  ;;  %3055 = vpow2.f32 %v2341_v63  ;;  %v1906_v11 = vpop.f32.mrb[36].mxu1 }
 0x76e   :  { %v3048_v7 = vpop.eup %3047  ;;  %v2376_v8 = vpack.c.bf16 %v3046_v5, %v3042_v61  ;;  %3057 = vpow2.f32 %v2346_v2  ;;  %v1907_v12 = vadd.f32 %v1906_v11, %v1456_v36  ;;  %v1908_v13 = vpop.f32.mrb[37].mxu1 }
 0x76f   :  { %v2377_v10 = vpack.c.bf16 %v3048_v7, %v3044_v1  ;;  %3059 = vpow2.f32 %v2347_v6  ;;  %v1909_v14 = vadd.f32 %v1908_v13, %v1460_v39  ;;  %v1910_v15 = vpop.f32.mrb[38].mxu1 }
 0x770   :  { %2169 = vst [vmem:[#allocation2 + $0x38] sm:$0xff] %v2376_v8  ;;  %3061 = vpow2.f32 %v2348_v9  ;;  %v2353_v16 = vmul.f32 -1.442695, %v1907_v12  ;;  %v1911_v17 = vpop.f32.mrb[39].mxu1 }
 0x771   :  { %2170 = vst [vmem:[#allocation2 + $0x40] sm:$0xff] %v2377_v10  ;;  %v2354_v18 = vmul.f32 -1.442695, %v1909_v14 }
 0x772   :  { %3063 = vpow2.f32 %v2353_v16 }
 0x773   :  { %3065 = vpow2.f32 %v2354_v18 }
 0x774   :  { %v3050_v20 = vpop.eup %3049 }
 0x775   :  { %v3052_v21 = vpop.eup %3051  ;;  %v2028_v23 = vadd.f32 1.0, %v3050_v20 }
 0x776   :  { %v3054_v24 = vpop.eup %3053  ;;  %v2044_v25 = vadd.f32 1.0, %v3052_v21 }
 0x777   :  { %v3056_v27 = vpop.eup %3055  ;;  %3067 = vrcp.f32 %v2028_v23  ;;  %v2029_v26 = vadd.f32 1.0, %v3054_v24 }
 0x778   :  { %v3058_v28 = vpop.eup %3057  ;;  %3069 = vrcp.f32 %v2044_v25  ;;  %v2030_v29 = vadd.f32 1.0, %v3056_v27 }
 0x779   :  { %v3060_v30 = vpop.eup %3059  ;;  %3071 = vrcp.f32 %v2029_v26  ;;  %v2035_v31 = vadd.f32 1.0, %v3058_v28 }
 0x77a   :  { %v3062_v32 = vpop.eup %3061  ;;  %3073 = vrcp.f32 %v2030_v29  ;;  %v2036_v33 = vadd.f32 1.0, %v3060_v30 }
 0x77b   :  { %3075 = vrcp.f32 %v2035_v31  ;;  %v2037_v34 = vadd.f32 1.0, %v3062_v32 }
 0x77c   :  { %v3064_v35 = vpop.eup %3063  ;;  %3077 = vrcp.f32 %v2036_v33 }
 0x77d   :  { %v3066_v36 = vpop.eup %3065  ;;  %3079 = vrcp.f32 %v2037_v34  ;;  %v2042_v37 = vadd.f32 1.0, %v3064_v35 }
 0x77e   :  { %v2043_v38 = vadd.f32 1.0, %v3066_v36 }
 0x77f   :  { %3081 = vrcp.f32 %v2042_v37 }
 0x780   :  { %3083 = vrcp.f32 %v2043_v38 }
 0x781   :  { %v3068_v39 = vpop.eup %3067 }
 0x782   :  { %v3070_v40 = vpop.eup %3069 }
 0x783   :  { %v3072_v41 = vpop.eup %3071  ;;  %v2379_v42 = vpack.c.bf16 %v3070_v40, %v3070_v40 }
 0x784   :  { %v3074_v43 = vpop.eup %3073  ;;  %v2370_v44 = vpack.c.bf16 %v3072_v41, %v3068_v39 }
 0x785   :  { %v3076_v45 = vpop.eup %3075  ;;  %2172 = vst.msk [vmem:[#allocation2 + $0x50] sm:$0xf] %vm2163_vm7, %v2379_v42  ;;  %v2371_v19 = vpack.c.bf16 %v3074_v43, %v3074_v43 }
 0x786   :  { %v3078_v46 = vpop.eup %3077  ;;  %2162 = vst [vmem:[#allocation2 + $0x10] sm:$0xff] %v2370_v44 }
 0x787   :  { %v3080_v47 = vpop.eup %3079  ;;  %2164 = vst.msk [vmem:[#allocation2 + $0x18] sm:$0xf] %vm2163_vm7, %v2371_v19  ;;  %v2374_v48 = vpack.c.bf16 %v3078_v46, %v3076_v45 }
 0x788   :  { %v2375_v49 = vpack.c.bf16 %v3080_v47, %v3080_v47 }
 0x789   :  { %v3082_v50 = vpop.eup %3081  ;;  %2167 = vst [vmem:[#allocation2 + $0x2c] sm:$0xff] %v2374_v48 }
 0x78a   :  { %v3084_v51 = vpop.eup %3083  ;;  %2168 = vst.msk [vmem:[#allocation2 + $0x34] sm:$0xf] %vm2163_vm7, %v2375_v49 }
 0x78b   :  { %v2378_v52 = vpack.c.bf16 %v3084_v51, %v3082_v50 }
 0x78d   :  { %2171 = vst [vmem:[#allocation2 + $0x48] sm:$0xff] %v2378_v52 }
 0x78e   :  { %3096 = shalt.err (!%p3093_p4)
}
 0x78f   :  { %s3097_s17 = scalar_lea.hbm %s3888_s18, 1344 }
 0x790   :  { %p3098_p5 = scmp.ne.s32.totalorder %s3888_s18, %s3097_s17  ;;  %p3101_p6 = scmp.lt.u32.totalorder %s3097_s17, %s3888_s18 }
 0x792   :  { %p3103_p7 = pnand %p3101_p6, %p3098_p5 }
 0x794   :  { %3106 = shalt.err (!%p3103_p7)
}
 0x795   :  { %s3115_s27 = smov 448   ;;  %s3116_s6 = smov 28  }
 0x796   :  { %2186 = dma.vmem_to_hbm [thread:$0]  %s2181_s16, 1344, %s3888_s18, [#allocation3], %s3115_s27, %s3115_s27, %s3116_s6  }
 0x797   :  { %3107 = dma.done.wait [#allocation3], 1344  }
 0x798   :  { %3108 = vsyncadd [#allocation3], 4294965952 }
 0x799   :  { %2192 = vsyncpa [#allocation3], 1 }

</bundles_post_ra>
